<compile_context>
chip_gen: v5e
topology: v5e:2x2
jax: 0.10.0
libtpu: 0.0.40
codegen_flags: <defaults>
</compile_context>

<pallas_src>
import jax
import jax.numpy as jnp
from jax.experimental import pallas as pl
from jax.experimental.pallas import tpu as pltpu

# ----------------------------- configuration --------------------------------
B = 2              # batch
N = 8              # sequence length
D = 32             # embedding_dim
NUM_HEADS = 2
HEAD_DIM = 16
INNER = NUM_HEADS * HEAD_DIM      # 32
FFN = 64           # feedforward_dim
DEPTH = 2
SCALE = HEAD_DIM ** (-0.5)
EPS = 1e-5         # PyTorch nn.LayerNorm default


# --------------------------- in-kernel helpers -------------------------------
def _normalize(x):
    # LayerNorm without affine (gamma/beta folded into downstream weights).
    mean = jnp.mean(x, axis=-1, keepdims=True)
    xc = x - mean
    var = jnp.mean(xc * xc, axis=-1, keepdims=True)
    return xc * jax.lax.rsqrt(var + EPS)


def _gelu_exact(x):
    # PyTorch nn.GELU default: exact erf formulation.
    return 0.5 * x * (1.0 + jax.lax.erf(x * (2.0 ** -0.5)))


# ------------------------------- fused kernel --------------------------------
def encoder_kernel(x_ref,
                   wq_ref, bq_ref, wk_ref, bk_ref, wv_ref, bv_ref,
                   wo_ref, bo_ref,
                   w1_ref, b1_ref, w2_ref, b2_ref,
                   fg_ref, fb_ref,
                   o_ref):
    x = x_ref[0]                                            # (N, D) residual stream

    for l in range(DEPTH):                                  # static unroll over layers
        # ---- multi-head self-attention (pre-norm; LN affine + scale folded) ----
        xn = _normalize(x)                                  # (N, D)
        attn = None
        for h in range(NUM_HEADS):                          # static unroll over heads
            q = jnp.dot(xn, wq_ref[l, h], preferred_element_type=jnp.float32) + bq_ref[l, h]
            k = jnp.dot(xn, wk_ref[l, h], preferred_element_type=jnp.float32) + bk_ref[l, h]
            v = jnp.dot(xn, wv_ref[l, h], preferred_element_type=jnp.float32) + bv_ref[l, h]
            # scores = q @ k^T (scale already folded into q weights/bias)
            s = jax.lax.dot_general(q, k, (((1,), (1,)), ((), ())),
                                    preferred_element_type=jnp.float32)   # (N, N)
            s = s - jnp.max(s, axis=-1, keepdims=True)
            p = jnp.exp(s)
            p = p * pl.reciprocal(jnp.sum(p, axis=-1, keepdims=True), approx=True)
            ctx = jnp.dot(p, v, preferred_element_type=jnp.float32)       # (N, HEAD_DIM)
            # accumulate this head's output-projection contribution (no concat)
            contrib = jnp.dot(ctx, wo_ref[l, h], preferred_element_type=jnp.float32)
            attn = contrib if attn is None else attn + contrib
        x = x + attn + bo_ref[l]                            # residual + out-proj bias

        # ---- feed-forward (pre-norm; LN affine folded into w1/b1) ----
        xn = _normalize(x)
        hid = jnp.dot(xn, w1_ref[l], preferred_element_type=jnp.float32) + b1_ref[l]
        hid = _gelu_exact(hid)
        x = x + jnp.dot(hid, w2_ref[l], preferred_element_type=jnp.float32) + b2_ref[l]

    # ---- final LayerNorm (affine applied here) ----
    o_ref[0] = (_normalize(x) * fg_ref[...] + fb_ref[...]).astype(o_ref.dtype)


# ------------------------------- wrapper --------------------------------------
_WEIGHT_ORDER = ("wq", "bq", "wk", "bk", "wv", "bv", "wo", "bo",
                 "w1", "b1", "w2", "b2", "fg", "fb")


def _full_spec(shape):
    n = len(shape)
    return pl.BlockSpec(shape, lambda b, _n=n: (0,) * _n)   # whole array, VMEM resident


@jax.jit
def transformer_encoder(x, packed):
    weights = [packed[k] for k in _WEIGHT_ORDER]
    in_specs = [pl.BlockSpec((1, N, D), lambda b: (b, 0, 0))]
    in_specs += [_full_spec(w.shape) for w in weights]
    return pl.pallas_call(
        encoder_kernel,
        out_shape=jax.ShapeDtypeStruct((B, N, D), x.dtype),
        grid=(B,),
        in_specs=in_specs,
        out_specs=pl.BlockSpec((1, N, D), lambda b: (b, 0, 0)),
        compiler_params=pltpu.CompilerParams(dimension_semantics=("parallel",)),
    )(x, *weights)


# --------------------------- parameter construction ---------------------------
def init_params(key):
    """Parameters in the PyTorch module's layout (x @ W convention, W is (in, out))."""
    layers = []
    for _ in range(DEPTH):
        key, *ks = jax.random.split(key, 12)
        layers.append(dict(
            attn_ln_g=1.0 + 0.1 * jax.random.normal(ks[0], (D,), jnp.float32),
            attn_ln_b=0.1 * jax.random.normal(ks[1], (D,), jnp.float32),
            w_qkv=0.02 * jax.random.normal(ks[2], (D, 3 * INNER), jnp.float32),   # no bias
            w_out=0.02 * jax.random.normal(ks[3], (INNER, D), jnp.float32),
            b_out=0.02 * jax.random.normal(ks[4], (D,), jnp.float32),
            ffn_ln_g=1.0 + 0.1 * jax.random.normal(ks[5], (D,), jnp.float32),
            ffn_ln_b=0.1 * jax.random.normal(ks[6], (D,), jnp.float32),
            w1=0.02 * jax.random.normal(ks[7], (D, FFN), jnp.float32),
            b1=0.02 * jax.random.normal(ks[8], (FFN,), jnp.float32),
            w2=0.02 * jax.random.normal(ks[9], (FFN, D), jnp.float32),
            b2=0.02 * jax.random.normal(ks[10], (D,), jnp.float32),
        ))
    key, k1, k2 = jax.random.split(key, 3)
    final = dict(ln_g=1.0 + 0.1 * jax.random.normal(k1, (D,), jnp.float32),
                 ln_b=0.1 * jax.random.normal(k2, (D,), jnp.float32))
    return layers, final


def prepare_params(layers, final):
    """Host-side: fold LN affine + attention scale into weights, split heads, stack layers."""
    wq, bq, wk, bk, wv, bv = [], [], [], [], [], []
    wo, bo, w1, b1, w2, b2 = [], [], [], [], [], []
    for layer in layers:
        g, bta = layer["attn_ln_g"], layer["attn_ln_b"]
        w_qkv_g = g[:, None] * layer["w_qkv"]                  # fold gamma into QKV weights
        b_qkv = bta @ layer["w_qkv"]                           # fold beta (QKV has no bias)
        wq_l, wk_l, wv_l = jnp.split(w_qkv_g, 3, axis=1)       # (D, INNER) each
        bq_l, bk_l, bv_l = jnp.split(b_qkv, 3)                 # (INNER,) each
        # per-head layouts: (h, d) split of the INNER axis (h-major, matching rearrange)
        wq.append(SCALE * wq_l.reshape(D, NUM_HEADS, HEAD_DIM).transpose(1, 0, 2))
        bq.append(SCALE * bq_l.reshape(NUM_HEADS, 1, HEAD_DIM))
        wk.append(wk_l.reshape(D, NUM_HEADS, HEAD_DIM).transpose(1, 0, 2))
        bk.append(bk_l.reshape(NUM_HEADS, 1, HEAD_DIM))
        wv.append(wv_l.reshape(D, NUM_HEADS, HEAD_DIM).transpose(1, 0, 2))
        bv.append(bv_l.reshape(NUM_HEADS, 1, HEAD_DIM))
        wo.append(layer["w_out"].reshape(NUM_HEADS, HEAD_DIM, D))
        bo.append(layer["b_out"].reshape(1, D))
        g2, bt2 = layer["ffn_ln_g"], layer["ffn_ln_b"]
        w1.append(g2[:, None] * layer["w1"])                   # fold gamma into FFN w1
        b1.append((layer["b1"] + bt2 @ layer["w1"]).reshape(1, FFN))
        w2.append(layer["w2"])
        b2.append(layer["b2"].reshape(1, D))
    return dict(
        wq=jnp.stack(wq), bq=jnp.stack(bq), wk=jnp.stack(wk), bk=jnp.stack(bk),
        wv=jnp.stack(wv), bv=jnp.stack(bv), wo=jnp.stack(wo), bo=jnp.stack(bo),
        w1=jnp.stack(w1), b1=jnp.stack(b1), w2=jnp.stack(w2), b2=jnp.stack(b2),
        fg=final["ln_g"].reshape(1, D), fb=final["ln_b"].reshape(1, D),
    )


# ------------------------- pure-JAX reference (unfolded) ----------------------
def reference_forward(x, layers, final):
    def ln(t, g, b):
        mu = jnp.mean(t, axis=-1, keepdims=True)
        var = jnp.mean((t - mu) ** 2, axis=-1, keepdims=True)
        return (t - mu) * jax.lax.rsqrt(var + EPS) * g + b

    def split_heads(t):
        return t.reshape(B, N, NUM_HEADS, HEAD_DIM).transpose(0, 2, 1, 3)

    for layer in layers:
        xn = ln(x, layer["attn_ln_g"], layer["attn_ln_b"])
        qkv = xn @ layer["w_qkv"]
        q, k, v = map(split_heads, jnp.split(qkv, 3, axis=-1))
        s = jnp.einsum("bhnd,bhmd->bhnm", q, k) * SCALE
        p = jax.nn.softmax(s, axis=-1)
        ctx = jnp.einsum("bhnm,bhmd->bhnd", p, v)
        ctx = ctx.transpose(0, 2, 1, 3).reshape(B, N, INNER)
        x = x + ctx @ layer["w_out"] + layer["b_out"]
        xn = ln(x, layer["ffn_ln_g"], layer["ffn_ln_b"])
        hid = xn @ layer["w1"] + layer["b1"]
        hid = 0.5 * hid * (1.0 + jax.lax.erf(hid * (2.0 ** -0.5)))
        x = x + hid @ layer["w2"] + layer["b2"]
    return ln(x, final["ln_g"], final["ln_b"])


# ------------------------------------ main ------------------------------------
if __name__ == "__main__":
    key = jax.random.PRNGKey(0)
    k_x, k_p = jax.random.split(key)
    x = jax.random.normal(k_x, (B, N, D), jnp.float32)

    layers, final = init_params(k_p)
    packed = prepare_params(layers, final)

    out = transformer_encoder(x, packed)
    jax.block_until_ready(out)
    assert out.shape == (B, N, D)

    ref = reference_forward(x, layers, final)
    max_err = float(jnp.max(jnp.abs(out - ref)))
    assert max_err < 1e-2, f"kernel/reference mismatch: max abs err = {max_err}"

    print("KERNEL_OK")
</pallas_src>

<mosaic_0001>
module attributes {stable_mosaic.version = 11 : i64} {
  func.func @encoder_kernel(%arg0: i32, %arg1: memref<1x8x32xf32, #tpu.memory_space<vmem>>, %arg2: memref<2x2x32x16xf32, #tpu.memory_space<vmem>>, %arg3: memref<2x2x1x16xf32, #tpu.memory_space<vmem>>, %arg4: memref<2x2x32x16xf32, #tpu.memory_space<vmem>>, %arg5: memref<2x2x1x16xf32, #tpu.memory_space<vmem>>, %arg6: memref<2x2x32x16xf32, #tpu.memory_space<vmem>>, %arg7: memref<2x2x1x16xf32, #tpu.memory_space<vmem>>, %arg8: memref<2x2x16x32xf32, #tpu.memory_space<vmem>>, %arg9: memref<2x1x32xf32, #tpu.memory_space<vmem>>, %arg10: memref<2x32x64xf32, #tpu.memory_space<vmem>>, %arg11: memref<2x1x64xf32, #tpu.memory_space<vmem>>, %arg12: memref<2x64x32xf32, #tpu.memory_space<vmem>>, %arg13: memref<2x1x32xf32, #tpu.memory_space<vmem>>, %arg14: memref<1x32xf32, #tpu.memory_space<vmem>>, %arg15: memref<1x32xf32, #tpu.memory_space<vmem>>, %arg16: memref<1x8x32xf32, #tpu.memory_space<vmem>>) attributes {dimension_semantics = [#tpu.dimension_semantics<parallel>], iteration_bounds = array<i64: 2>, scalar_prefetch = 0 : i64, scratch_operands = 0 : i64, tpu.core_type = #tpu.core_type<tc>, window_params = [{transform_indices = @transform_0, window_bounds = array<i64: 1, 8, 32>}, {pipeline_mode = #tpu.pipeline_mode<synchronous>, transform_indices = @transform_1, window_bounds = array<i64: 2, 2, 32, 16>}, {pipeline_mode = #tpu.pipeline_mode<synchronous>, transform_indices = @transform_2, window_bounds = array<i64: 2, 2, 1, 16>}, {pipeline_mode = #tpu.pipeline_mode<synchronous>, transform_indices = @transform_3, window_bounds = array<i64: 2, 2, 32, 16>}, {pipeline_mode = #tpu.pipeline_mode<synchronous>, transform_indices = @transform_4, window_bounds = array<i64: 2, 2, 1, 16>}, {pipeline_mode = #tpu.pipeline_mode<synchronous>, transform_indices = @transform_5, window_bounds = array<i64: 2, 2, 32, 16>}, {pipeline_mode = #tpu.pipeline_mode<synchronous>, transform_indices = @transform_6, window_bounds = array<i64: 2, 2, 1, 16>}, {pipeline_mode = #tpu.pipeline_mode<synchronous>, transform_indices = @transform_7, window_bounds = array<i64: 2, 2, 16, 32>}, {pipeline_mode = #tpu.pipeline_mode<synchronous>, transform_indices = @transform_8, window_bounds = array<i64: 2, 1, 32>}, {pipeline_mode = #tpu.pipeline_mode<synchronous>, transform_indices = @transform_9, window_bounds = array<i64: 2, 32, 64>}, {pipeline_mode = #tpu.pipeline_mode<synchronous>, transform_indices = @transform_10, window_bounds = array<i64: 2, 1, 64>}, {pipeline_mode = #tpu.pipeline_mode<synchronous>, transform_indices = @transform_11, window_bounds = array<i64: 2, 64, 32>}, {pipeline_mode = #tpu.pipeline_mode<synchronous>, transform_indices = @transform_12, window_bounds = array<i64: 2, 1, 32>}, {pipeline_mode = #tpu.pipeline_mode<synchronous>, transform_indices = @transform_13, window_bounds = array<i64: 1, 32>}, {pipeline_mode = #tpu.pipeline_mode<synchronous>, transform_indices = @transform_14, window_bounds = array<i64: 1, 32>}, {transform_indices = @transform_15, window_bounds = array<i64: 1, 8, 32>}]} {
    %c0 = arith.constant 0 : index
    %c0_0 = arith.constant 0 : index
    %c0_1 = arith.constant 0 : index
    %0 = vector.load %arg1[%c0, %c0_0, %c0_1] : memref<1x8x32xf32, #tpu.memory_space<vmem>>, vector<1x8x32xf32>
    %1 = vector.shape_cast %0 : vector<1x8x32xf32> to vector<8x32xf32>
    %cst = arith.constant dense<0.000000e+00> : vector<8xf32>
    %2 = vector.multi_reduction <add>, %1, %cst [1] : vector<8x32xf32> to vector<8xf32>
    %3 = vector.shape_cast %2 : vector<8xf32> to vector<8x1xf32>
    %cst_2 = arith.constant 3.200000e+01 : f32
    %4 = vector.broadcast %cst_2 : f32 to vector<8x1xf32>
    %5 = arith.divf %3, %4 : vector<8x1xf32>
    %6 = vector.broadcast %5 : vector<8x1xf32> to vector<8x32xf32>
    %7 = arith.subf %1, %6 : vector<8x32xf32>
    %8 = arith.mulf %7, %7 : vector<8x32xf32>
    %cst_3 = arith.constant dense<0.000000e+00> : vector<8xf32>
    %9 = vector.multi_reduction <add>, %8, %cst_3 [1] : vector<8x32xf32> to vector<8xf32>
    %10 = vector.shape_cast %9 : vector<8xf32> to vector<8x1xf32>
    %cst_4 = arith.constant 3.200000e+01 : f32
    %11 = vector.broadcast %cst_4 : f32 to vector<8x1xf32>
    %12 = arith.divf %10, %11 : vector<8x1xf32>
    %cst_5 = arith.constant 9.99999974E-6 : f32
    %13 = vector.broadcast %cst_5 : f32 to vector<8x1xf32>
    %14 = arith.addf %12, %13 : vector<8x1xf32>
    %15 = math.rsqrt %14 : vector<8x1xf32>
    %16 = vector.broadcast %15 : vector<8x1xf32> to vector<8x32xf32>
    %17 = arith.mulf %7, %16 : vector<8x32xf32>
    %c0_6 = arith.constant 0 : index
    %c0_7 = arith.constant 0 : index
    %c0_8 = arith.constant 0 : index
    %c0_9 = arith.constant 0 : index
    %18 = vector.load %arg2[%c0_6, %c0_7, %c0_8, %c0_9] : memref<2x2x32x16xf32, #tpu.memory_space<vmem>>, vector<1x1x32x16xf32>
    %19 = vector.shape_cast %18 : vector<1x1x32x16xf32> to vector<32x16xf32>
    %cst_10 = arith.constant dense<0.000000e+00> : vector<8x16xf32>
    %20 = tpu.matmul %17, %19, %cst_10 {dimension_numbers = #tpu.dot_dimension_numbers<[1], [0], [0], [1], [0, 0, 1, 1], [], []>} : vector<8x32xf32>, vector<32x16xf32>, vector<8x16xf32> -> vector<8x16xf32>
    %c0_11 = arith.constant 0 : index
    %c0_12 = arith.constant 0 : index
    %c0_13 = arith.constant 0 : index
    %c0_14 = arith.constant 0 : index
    %21 = vector.load %arg3[%c0_11, %c0_12, %c0_13, %c0_14] : memref<2x2x1x16xf32, #tpu.memory_space<vmem>>, vector<1x1x1x16xf32>
    %22 = vector.shape_cast %21 : vector<1x1x1x16xf32> to vector<1x16xf32>
    %23 = vector.broadcast %22 : vector<1x16xf32> to vector<8x16xf32>
    %24 = arith.addf %20, %23 : vector<8x16xf32>
    %c0_15 = arith.constant 0 : index
    %c0_16 = arith.constant 0 : index
    %c0_17 = arith.constant 0 : index
    %c0_18 = arith.constant 0 : index
    %25 = vector.load %arg4[%c0_15, %c0_16, %c0_17, %c0_18] : memref<2x2x32x16xf32, #tpu.memory_space<vmem>>, vector<1x1x32x16xf32>
    %26 = vector.shape_cast %25 : vector<1x1x32x16xf32> to vector<32x16xf32>
    %cst_19 = arith.constant dense<0.000000e+00> : vector<8x16xf32>
    %27 = tpu.matmul %17, %26, %cst_19 {dimension_numbers = #tpu.dot_dimension_numbers<[1], [0], [0], [1], [0, 0, 1, 1], [], []>} : vector<8x32xf32>, vector<32x16xf32>, vector<8x16xf32> -> vector<8x16xf32>
    %c0_20 = arith.constant 0 : index
    %c0_21 = arith.constant 0 : index
    %c0_22 = arith.constant 0 : index
    %c0_23 = arith.constant 0 : index
    %28 = vector.load %arg5[%c0_20, %c0_21, %c0_22, %c0_23] : memref<2x2x1x16xf32, #tpu.memory_space<vmem>>, vector<1x1x1x16xf32>
    %29 = vector.shape_cast %28 : vector<1x1x1x16xf32> to vector<1x16xf32>
    %30 = vector.broadcast %29 : vector<1x16xf32> to vector<8x16xf32>
    %31 = arith.addf %27, %30 : vector<8x16xf32>
    %c0_24 = arith.constant 0 : index
    %c0_25 = arith.constant 0 : index
    %c0_26 = arith.constant 0 : index
    %c0_27 = arith.constant 0 : index
    %32 = vector.load %arg6[%c0_24, %c0_25, %c0_26, %c0_27] : memref<2x2x32x16xf32, #tpu.memory_space<vmem>>, vector<1x1x32x16xf32>
    %33 = vector.shape_cast %32 : vector<1x1x32x16xf32> to vector<32x16xf32>
    %cst_28 = arith.constant dense<0.000000e+00> : vector<8x16xf32>
    %34 = tpu.matmul %17, %33, %cst_28 {dimension_numbers = #tpu.dot_dimension_numbers<[1], [0], [0], [1], [0, 0, 1, 1], [], []>} : vector<8x32xf32>, vector<32x16xf32>, vector<8x16xf32> -> vector<8x16xf32>
    %c0_29 = arith.constant 0 : index
    %c0_30 = arith.constant 0 : index
    %c0_31 = arith.constant 0 : index
    %c0_32 = arith.constant 0 : index
    %35 = vector.load %arg7[%c0_29, %c0_30, %c0_31, %c0_32] : memref<2x2x1x16xf32, #tpu.memory_space<vmem>>, vector<1x1x1x16xf32>
    %36 = vector.shape_cast %35 : vector<1x1x1x16xf32> to vector<1x16xf32>
    %37 = vector.broadcast %36 : vector<1x16xf32> to vector<8x16xf32>
    %38 = arith.addf %34, %37 : vector<8x16xf32>
    %cst_33 = arith.constant dense<0.000000e+00> : vector<8x8xf32>
    %39 = tpu.matmul %24, %31, %cst_33 {dimension_numbers = #tpu.dot_dimension_numbers<[1], [1], [0], [0], [0, 0, 1, 0], [], []>} : vector<8x16xf32>, vector<8x16xf32>, vector<8x8xf32> -> vector<8x8xf32>
    %cst_34 = arith.constant dense<0xFF800000> : vector<8xf32>
    %40 = vector.multi_reduction <maximumf>, %39, %cst_34 [1] : vector<8x8xf32> to vector<8xf32>
    %41 = vector.shape_cast %40 : vector<8xf32> to vector<8x1xf32>
    %42 = vector.broadcast %41 : vector<8x1xf32> to vector<8x8xf32>
    %43 = arith.subf %39, %42 : vector<8x8xf32>
    %44 = math.exp %43 : vector<8x8xf32>
    %cst_35 = arith.constant dense<0.000000e+00> : vector<8xf32>
    %45 = vector.multi_reduction <add>, %44, %cst_35 [1] : vector<8x8xf32> to vector<8xf32>
    %46 = vector.shape_cast %45 : vector<8xf32> to vector<8x1xf32>
    %47 = tpu.reciprocal %46 {approx = true} : vector<8x1xf32> -> vector<8x1xf32>
    %48 = vector.broadcast %47 : vector<8x1xf32> to vector<8x8xf32>
    %49 = arith.mulf %44, %48 : vector<8x8xf32>
    %cst_36 = arith.constant dense<0.000000e+00> : vector<8x16xf32>
    %50 = tpu.matmul %49, %38, %cst_36 {dimension_numbers = #tpu.dot_dimension_numbers<[1], [0], [0], [1], [0, 0, 1, 1], [], []>} : vector<8x8xf32>, vector<8x16xf32>, vector<8x16xf32> -> vector<8x16xf32>
    %c0_37 = arith.constant 0 : index
    %c0_38 = arith.constant 0 : index
    %c0_39 = arith.constant 0 : index
    %c0_40 = arith.constant 0 : index
    %51 = vector.load %arg8[%c0_37, %c0_38, %c0_39, %c0_40] : memref<2x2x16x32xf32, #tpu.memory_space<vmem>>, vector<1x1x16x32xf32>
    %52 = vector.shape_cast %51 : vector<1x1x16x32xf32> to vector<16x32xf32>
    %cst_41 = arith.constant dense<0.000000e+00> : vector<8x32xf32>
    %53 = tpu.matmul %50, %52, %cst_41 {dimension_numbers = #tpu.dot_dimension_numbers<[1], [0], [0], [1], [0, 0, 1, 1], [], []>} : vector<8x16xf32>, vector<16x32xf32>, vector<8x32xf32> -> vector<8x32xf32>
    %c0_42 = arith.constant 0 : index
    %c1 = arith.constant 1 : index
    %c0_43 = arith.constant 0 : index
    %c0_44 = arith.constant 0 : index
    %54 = vector.load %arg2[%c0_42, %c1, %c0_43, %c0_44] : memref<2x2x32x16xf32, #tpu.memory_space<vmem>>, vector<1x1x32x16xf32>
    %55 = vector.shape_cast %54 : vector<1x1x32x16xf32> to vector<32x16xf32>
    %cst_45 = arith.constant dense<0.000000e+00> : vector<8x16xf32>
    %56 = tpu.matmul %17, %55, %cst_45 {dimension_numbers = #tpu.dot_dimension_numbers<[1], [0], [0], [1], [0, 0, 1, 1], [], []>} : vector<8x32xf32>, vector<32x16xf32>, vector<8x16xf32> -> vector<8x16xf32>
    %c0_46 = arith.constant 0 : index
    %c1_47 = arith.constant 1 : index
    %c0_48 = arith.constant 0 : index
    %c0_49 = arith.constant 0 : index
    %57 = vector.load %arg3[%c0_46, %c1_47, %c0_48, %c0_49] : memref<2x2x1x16xf32, #tpu.memory_space<vmem>>, vector<1x1x1x16xf32>
    %58 = vector.shape_cast %57 : vector<1x1x1x16xf32> to vector<1x16xf32>
    %59 = vector.broadcast %58 : vector<1x16xf32> to vector<8x16xf32>
    %60 = arith.addf %56, %59 : vector<8x16xf32>
    %c0_50 = arith.constant 0 : index
    %c1_51 = arith.constant 1 : index
    %c0_52 = arith.constant 0 : index
    %c0_53 = arith.constant 0 : index
    %61 = vector.load %arg4[%c0_50, %c1_51, %c0_52, %c0_53] : memref<2x2x32x16xf32, #tpu.memory_space<vmem>>, vector<1x1x32x16xf32>
    %62 = vector.shape_cast %61 : vector<1x1x32x16xf32> to vector<32x16xf32>
    %cst_54 = arith.constant dense<0.000000e+00> : vector<8x16xf32>
    %63 = tpu.matmul %17, %62, %cst_54 {dimension_numbers = #tpu.dot_dimension_numbers<[1], [0], [0], [1], [0, 0, 1, 1], [], []>} : vector<8x32xf32>, vector<32x16xf32>, vector<8x16xf32> -> vector<8x16xf32>
    %c0_55 = arith.constant 0 : index
    %c1_56 = arith.constant 1 : index
    %c0_57 = arith.constant 0 : index
    %c0_58 = arith.constant 0 : index
    %64 = vector.load %arg5[%c0_55, %c1_56, %c0_57, %c0_58] : memref<2x2x1x16xf32, #tpu.memory_space<vmem>>, vector<1x1x1x16xf32>
    %65 = vector.shape_cast %64 : vector<1x1x1x16xf32> to vector<1x16xf32>
    %66 = vector.broadcast %65 : vector<1x16xf32> to vector<8x16xf32>
    %67 = arith.addf %63, %66 : vector<8x16xf32>
    %c0_59 = arith.constant 0 : index
    %c1_60 = arith.constant 1 : index
    %c0_61 = arith.constant 0 : index
    %c0_62 = arith.constant 0 : index
    %68 = vector.load %arg6[%c0_59, %c1_60, %c0_61, %c0_62] : memref<2x2x32x16xf32, #tpu.memory_space<vmem>>, vector<1x1x32x16xf32>
    %69 = vector.shape_cast %68 : vector<1x1x32x16xf32> to vector<32x16xf32>
    %cst_63 = arith.constant dense<0.000000e+00> : vector<8x16xf32>
    %70 = tpu.matmul %17, %69, %cst_63 {dimension_numbers = #tpu.dot_dimension_numbers<[1], [0], [0], [1], [0, 0, 1, 1], [], []>} : vector<8x32xf32>, vector<32x16xf32>, vector<8x16xf32> -> vector<8x16xf32>
    %c0_64 = arith.constant 0 : index
    %c1_65 = arith.constant 1 : index
    %c0_66 = arith.constant 0 : index
    %c0_67 = arith.constant 0 : index
    %71 = vector.load %arg7[%c0_64, %c1_65, %c0_66, %c0_67] : memref<2x2x1x16xf32, #tpu.memory_space<vmem>>, vector<1x1x1x16xf32>
    %72 = vector.shape_cast %71 : vector<1x1x1x16xf32> to vector<1x16xf32>
    %73 = vector.broadcast %72 : vector<1x16xf32> to vector<8x16xf32>
    %74 = arith.addf %70, %73 : vector<8x16xf32>
    %cst_68 = arith.constant dense<0.000000e+00> : vector<8x8xf32>
    %75 = tpu.matmul %60, %67, %cst_68 {dimension_numbers = #tpu.dot_dimension_numbers<[1], [1], [0], [0], [0, 0, 1, 0], [], []>} : vector<8x16xf32>, vector<8x16xf32>, vector<8x8xf32> -> vector<8x8xf32>
    %cst_69 = arith.constant dense<0xFF800000> : vector<8xf32>
    %76 = vector.multi_reduction <maximumf>, %75, %cst_69 [1] : vector<8x8xf32> to vector<8xf32>
    %77 = vector.shape_cast %76 : vector<8xf32> to vector<8x1xf32>
    %78 = vector.broadcast %77 : vector<8x1xf32> to vector<8x8xf32>
    %79 = arith.subf %75, %78 : vector<8x8xf32>
    %80 = math.exp %79 : vector<8x8xf32>
    %cst_70 = arith.constant dense<0.000000e+00> : vector<8xf32>
    %81 = vector.multi_reduction <add>, %80, %cst_70 [1] : vector<8x8xf32> to vector<8xf32>
    %82 = vector.shape_cast %81 : vector<8xf32> to vector<8x1xf32>
    %83 = tpu.reciprocal %82 {approx = true} : vector<8x1xf32> -> vector<8x1xf32>
    %84 = vector.broadcast %83 : vector<8x1xf32> to vector<8x8xf32>
    %85 = arith.mulf %80, %84 : vector<8x8xf32>
    %cst_71 = arith.constant dense<0.000000e+00> : vector<8x16xf32>
    %86 = tpu.matmul %85, %74, %cst_71 {dimension_numbers = #tpu.dot_dimension_numbers<[1], [0], [0], [1], [0, 0, 1, 1], [], []>} : vector<8x8xf32>, vector<8x16xf32>, vector<8x16xf32> -> vector<8x16xf32>
    %c0_72 = arith.constant 0 : index
    %c1_73 = arith.constant 1 : index
    %c0_74 = arith.constant 0 : index
    %c0_75 = arith.constant 0 : index
    %87 = vector.load %arg8[%c0_72, %c1_73, %c0_74, %c0_75] : memref<2x2x16x32xf32, #tpu.memory_space<vmem>>, vector<1x1x16x32xf32>
    %88 = vector.shape_cast %87 : vector<1x1x16x32xf32> to vector<16x32xf32>
    %cst_76 = arith.constant dense<0.000000e+00> : vector<8x32xf32>
    %89 = tpu.matmul %86, %88, %cst_76 {dimension_numbers = #tpu.dot_dimension_numbers<[1], [0], [0], [1], [0, 0, 1, 1], [], []>} : vector<8x16xf32>, vector<16x32xf32>, vector<8x32xf32> -> vector<8x32xf32>
    %90 = arith.addf %53, %89 : vector<8x32xf32>
    %91 = arith.addf %1, %90 : vector<8x32xf32>
    %c0_77 = arith.constant 0 : index
    %c0_78 = arith.constant 0 : index
    %c0_79 = arith.constant 0 : index
    %92 = vector.load %arg9[%c0_77, %c0_78, %c0_79] : memref<2x1x32xf32, #tpu.memory_space<vmem>>, vector<1x1x32xf32>
    %93 = vector.shape_cast %92 : vector<1x1x32xf32> to vector<1x32xf32>
    %94 = vector.broadcast %93 : vector<1x32xf32> to vector<8x32xf32>
    %95 = arith.addf %91, %94 : vector<8x32xf32>
    %cst_80 = arith.constant dense<0.000000e+00> : vector<8xf32>
    %96 = vector.multi_reduction <add>, %95, %cst_80 [1] : vector<8x32xf32> to vector<8xf32>
    %97 = vector.shape_cast %96 : vector<8xf32> to vector<8x1xf32>
    %cst_81 = arith.constant 3.200000e+01 : f32
    %98 = vector.broadcast %cst_81 : f32 to vector<8x1xf32>
    %99 = arith.divf %97, %98 : vector<8x1xf32>
    %100 = vector.broadcast %99 : vector<8x1xf32> to vector<8x32xf32>
    %101 = arith.subf %95, %100 : vector<8x32xf32>
    %102 = arith.mulf %101, %101 : vector<8x32xf32>
    %cst_82 = arith.constant dense<0.000000e+00> : vector<8xf32>
    %103 = vector.multi_reduction <add>, %102, %cst_82 [1] : vector<8x32xf32> to vector<8xf32>
    %104 = vector.shape_cast %103 : vector<8xf32> to vector<8x1xf32>
    %cst_83 = arith.constant 3.200000e+01 : f32
    %105 = vector.broadcast %cst_83 : f32 to vector<8x1xf32>
    %106 = arith.divf %104, %105 : vector<8x1xf32>
    %cst_84 = arith.constant 9.99999974E-6 : f32
    %107 = vector.broadcast %cst_84 : f32 to vector<8x1xf32>
    %108 = arith.addf %106, %107 : vector<8x1xf32>
    %109 = math.rsqrt %108 : vector<8x1xf32>
    %110 = vector.broadcast %109 : vector<8x1xf32> to vector<8x32xf32>
    %111 = arith.mulf %101, %110 : vector<8x32xf32>
    %c0_85 = arith.constant 0 : index
    %c0_86 = arith.constant 0 : index
    %c0_87 = arith.constant 0 : index
    %112 = vector.load %arg10[%c0_85, %c0_86, %c0_87] : memref<2x32x64xf32, #tpu.memory_space<vmem>>, vector<1x32x64xf32>
    %113 = vector.shape_cast %112 : vector<1x32x64xf32> to vector<32x64xf32>
    %cst_88 = arith.constant dense<0.000000e+00> : vector<8x64xf32>
    %114 = tpu.matmul %111, %113, %cst_88 {dimension_numbers = #tpu.dot_dimension_numbers<[1], [0], [0], [1], [0, 0, 1, 1], [], []>} : vector<8x32xf32>, vector<32x64xf32>, vector<8x64xf32> -> vector<8x64xf32>
    %c0_89 = arith.constant 0 : index
    %c0_90 = arith.constant 0 : index
    %c0_91 = arith.constant 0 : index
    %115 = vector.load %arg11[%c0_89, %c0_90, %c0_91] : memref<2x1x64xf32, #tpu.memory_space<vmem>>, vector<1x1x64xf32>
    %116 = vector.shape_cast %115 : vector<1x1x64xf32> to vector<1x64xf32>
    %117 = vector.broadcast %116 : vector<1x64xf32> to vector<8x64xf32>
    %118 = arith.addf %114, %117 : vector<8x64xf32>
    %cst_92 = arith.constant 5.000000e-01 : f32
    %119 = vector.broadcast %cst_92 : f32 to vector<8x64xf32>
    %120 = arith.mulf %119, %118 : vector<8x64xf32>
    %cst_93 = arith.constant 0.707106769 : f32
    %121 = vector.broadcast %cst_93 : f32 to vector<8x64xf32>
    %122 = arith.mulf %118, %121 : vector<8x64xf32>
    %123 = math.erf %122 : vector<8x64xf32>
    %cst_94 = arith.constant 1.000000e+00 : f32
    %124 = vector.broadcast %cst_94 : f32 to vector<8x64xf32>
    %125 = arith.addf %124, %123 : vector<8x64xf32>
    %126 = arith.mulf %120, %125 : vector<8x64xf32>
    %c0_95 = arith.constant 0 : index
    %c0_96 = arith.constant 0 : index
    %c0_97 = arith.constant 0 : index
    %127 = vector.load %arg12[%c0_95, %c0_96, %c0_97] : memref<2x64x32xf32, #tpu.memory_space<vmem>>, vector<1x64x32xf32>
    %128 = vector.shape_cast %127 : vector<1x64x32xf32> to vector<64x32xf32>
    %cst_98 = arith.constant dense<0.000000e+00> : vector<8x32xf32>
    %129 = tpu.matmul %126, %128, %cst_98 {dimension_numbers = #tpu.dot_dimension_numbers<[1], [0], [0], [1], [0, 0, 1, 1], [], []>} : vector<8x64xf32>, vector<64x32xf32>, vector<8x32xf32> -> vector<8x32xf32>
    %130 = arith.addf %95, %129 : vector<8x32xf32>
    %c0_99 = arith.constant 0 : index
    %c0_100 = arith.constant 0 : index
    %c0_101 = arith.constant 0 : index
    %131 = vector.load %arg13[%c0_99, %c0_100, %c0_101] : memref<2x1x32xf32, #tpu.memory_space<vmem>>, vector<1x1x32xf32>
    %132 = vector.shape_cast %131 : vector<1x1x32xf32> to vector<1x32xf32>
    %133 = vector.broadcast %132 : vector<1x32xf32> to vector<8x32xf32>
    %134 = arith.addf %130, %133 : vector<8x32xf32>
    %cst_102 = arith.constant dense<0.000000e+00> : vector<8xf32>
    %135 = vector.multi_reduction <add>, %134, %cst_102 [1] : vector<8x32xf32> to vector<8xf32>
    %136 = vector.shape_cast %135 : vector<8xf32> to vector<8x1xf32>
    %cst_103 = arith.constant 3.200000e+01 : f32
    %137 = vector.broadcast %cst_103 : f32 to vector<8x1xf32>
    %138 = arith.divf %136, %137 : vector<8x1xf32>
    %139 = vector.broadcast %138 : vector<8x1xf32> to vector<8x32xf32>
    %140 = arith.subf %134, %139 : vector<8x32xf32>
    %141 = arith.mulf %140, %140 : vector<8x32xf32>
    %cst_104 = arith.constant dense<0.000000e+00> : vector<8xf32>
    %142 = vector.multi_reduction <add>, %141, %cst_104 [1] : vector<8x32xf32> to vector<8xf32>
    %143 = vector.shape_cast %142 : vector<8xf32> to vector<8x1xf32>
    %cst_105 = arith.constant 3.200000e+01 : f32
    %144 = vector.broadcast %cst_105 : f32 to vector<8x1xf32>
    %145 = arith.divf %143, %144 : vector<8x1xf32>
    %cst_106 = arith.constant 9.99999974E-6 : f32
    %146 = vector.broadcast %cst_106 : f32 to vector<8x1xf32>
    %147 = arith.addf %145, %146 : vector<8x1xf32>
    %148 = math.rsqrt %147 : vector<8x1xf32>
    %149 = vector.broadcast %148 : vector<8x1xf32> to vector<8x32xf32>
    %150 = arith.mulf %140, %149 : vector<8x32xf32>
    %c1_107 = arith.constant 1 : index
    %c0_108 = arith.constant 0 : index
    %c0_109 = arith.constant 0 : index
    %c0_110 = arith.constant 0 : index
    %151 = vector.load %arg2[%c1_107, %c0_108, %c0_109, %c0_110] : memref<2x2x32x16xf32, #tpu.memory_space<vmem>>, vector<1x1x32x16xf32>
    %152 = vector.shape_cast %151 : vector<1x1x32x16xf32> to vector<32x16xf32>
    %cst_111 = arith.constant dense<0.000000e+00> : vector<8x16xf32>
    %153 = tpu.matmul %150, %152, %cst_111 {dimension_numbers = #tpu.dot_dimension_numbers<[1], [0], [0], [1], [0, 0, 1, 1], [], []>} : vector<8x32xf32>, vector<32x16xf32>, vector<8x16xf32> -> vector<8x16xf32>
    %c1_112 = arith.constant 1 : index
    %c0_113 = arith.constant 0 : index
    %c0_114 = arith.constant 0 : index
    %c0_115 = arith.constant 0 : index
    %154 = vector.load %arg3[%c1_112, %c0_113, %c0_114, %c0_115] : memref<2x2x1x16xf32, #tpu.memory_space<vmem>>, vector<1x1x1x16xf32>
    %155 = vector.shape_cast %154 : vector<1x1x1x16xf32> to vector<1x16xf32>
    %156 = vector.broadcast %155 : vector<1x16xf32> to vector<8x16xf32>
    %157 = arith.addf %153, %156 : vector<8x16xf32>
    %c1_116 = arith.constant 1 : index
    %c0_117 = arith.constant 0 : index
    %c0_118 = arith.constant 0 : index
    %c0_119 = arith.constant 0 : index
    %158 = vector.load %arg4[%c1_116, %c0_117, %c0_118, %c0_119] : memref<2x2x32x16xf32, #tpu.memory_space<vmem>>, vector<1x1x32x16xf32>
    %159 = vector.shape_cast %158 : vector<1x1x32x16xf32> to vector<32x16xf32>
    %cst_120 = arith.constant dense<0.000000e+00> : vector<8x16xf32>
    %160 = tpu.matmul %150, %159, %cst_120 {dimension_numbers = #tpu.dot_dimension_numbers<[1], [0], [0], [1], [0, 0, 1, 1], [], []>} : vector<8x32xf32>, vector<32x16xf32>, vector<8x16xf32> -> vector<8x16xf32>
    %c1_121 = arith.constant 1 : index
    %c0_122 = arith.constant 0 : index
    %c0_123 = arith.constant 0 : index
    %c0_124 = arith.constant 0 : index
    %161 = vector.load %arg5[%c1_121, %c0_122, %c0_123, %c0_124] : memref<2x2x1x16xf32, #tpu.memory_space<vmem>>, vector<1x1x1x16xf32>
    %162 = vector.shape_cast %161 : vector<1x1x1x16xf32> to vector<1x16xf32>
    %163 = vector.broadcast %162 : vector<1x16xf32> to vector<8x16xf32>
    %164 = arith.addf %160, %163 : vector<8x16xf32>
    %c1_125 = arith.constant 1 : index
    %c0_126 = arith.constant 0 : index
    %c0_127 = arith.constant 0 : index
    %c0_128 = arith.constant 0 : index
    %165 = vector.load %arg6[%c1_125, %c0_126, %c0_127, %c0_128] : memref<2x2x32x16xf32, #tpu.memory_space<vmem>>, vector<1x1x32x16xf32>
    %166 = vector.shape_cast %165 : vector<1x1x32x16xf32> to vector<32x16xf32>
    %cst_129 = arith.constant dense<0.000000e+00> : vector<8x16xf32>
    %167 = tpu.matmul %150, %166, %cst_129 {dimension_numbers = #tpu.dot_dimension_numbers<[1], [0], [0], [1], [0, 0, 1, 1], [], []>} : vector<8x32xf32>, vector<32x16xf32>, vector<8x16xf32> -> vector<8x16xf32>
    %c1_130 = arith.constant 1 : index
    %c0_131 = arith.constant 0 : index
    %c0_132 = arith.constant 0 : index
    %c0_133 = arith.constant 0 : index
    %168 = vector.load %arg7[%c1_130, %c0_131, %c0_132, %c0_133] : memref<2x2x1x16xf32, #tpu.memory_space<vmem>>, vector<1x1x1x16xf32>
    %169 = vector.shape_cast %168 : vector<1x1x1x16xf32> to vector<1x16xf32>
    %170 = vector.broadcast %169 : vector<1x16xf32> to vector<8x16xf32>
    %171 = arith.addf %167, %170 : vector<8x16xf32>
    %cst_134 = arith.constant dense<0.000000e+00> : vector<8x8xf32>
    %172 = tpu.matmul %157, %164, %cst_134 {dimension_numbers = #tpu.dot_dimension_numbers<[1], [1], [0], [0], [0, 0, 1, 0], [], []>} : vector<8x16xf32>, vector<8x16xf32>, vector<8x8xf32> -> vector<8x8xf32>
    %cst_135 = arith.constant dense<0xFF800000> : vector<8xf32>
    %173 = vector.multi_reduction <maximumf>, %172, %cst_135 [1] : vector<8x8xf32> to vector<8xf32>
    %174 = vector.shape_cast %173 : vector<8xf32> to vector<8x1xf32>
    %175 = vector.broadcast %174 : vector<8x1xf32> to vector<8x8xf32>
    %176 = arith.subf %172, %175 : vector<8x8xf32>
    %177 = math.exp %176 : vector<8x8xf32>
    %cst_136 = arith.constant dense<0.000000e+00> : vector<8xf32>
    %178 = vector.multi_reduction <add>, %177, %cst_136 [1] : vector<8x8xf32> to vector<8xf32>
    %179 = vector.shape_cast %178 : vector<8xf32> to vector<8x1xf32>
    %180 = tpu.reciprocal %179 {approx = true} : vector<8x1xf32> -> vector<8x1xf32>
    %181 = vector.broadcast %180 : vector<8x1xf32> to vector<8x8xf32>
    %182 = arith.mulf %177, %181 : vector<8x8xf32>
    %cst_137 = arith.constant dense<0.000000e+00> : vector<8x16xf32>
    %183 = tpu.matmul %182, %171, %cst_137 {dimension_numbers = #tpu.dot_dimension_numbers<[1], [0], [0], [1], [0, 0, 1, 1], [], []>} : vector<8x8xf32>, vector<8x16xf32>, vector<8x16xf32> -> vector<8x16xf32>
    %c1_138 = arith.constant 1 : index
    %c0_139 = arith.constant 0 : index
    %c0_140 = arith.constant 0 : index
    %c0_141 = arith.constant 0 : index
    %184 = vector.load %arg8[%c1_138, %c0_139, %c0_140, %c0_141] : memref<2x2x16x32xf32, #tpu.memory_space<vmem>>, vector<1x1x16x32xf32>
    %185 = vector.shape_cast %184 : vector<1x1x16x32xf32> to vector<16x32xf32>
    %cst_142 = arith.constant dense<0.000000e+00> : vector<8x32xf32>
    %186 = tpu.matmul %183, %185, %cst_142 {dimension_numbers = #tpu.dot_dimension_numbers<[1], [0], [0], [1], [0, 0, 1, 1], [], []>} : vector<8x16xf32>, vector<16x32xf32>, vector<8x32xf32> -> vector<8x32xf32>
    %c1_143 = arith.constant 1 : index
    %c1_144 = arith.constant 1 : index
    %c0_145 = arith.constant 0 : index
    %c0_146 = arith.constant 0 : index
    %187 = vector.load %arg2[%c1_143, %c1_144, %c0_145, %c0_146] : memref<2x2x32x16xf32, #tpu.memory_space<vmem>>, vector<1x1x32x16xf32>
    %188 = vector.shape_cast %187 : vector<1x1x32x16xf32> to vector<32x16xf32>
    %cst_147 = arith.constant dense<0.000000e+00> : vector<8x16xf32>
    %189 = tpu.matmul %150, %188, %cst_147 {dimension_numbers = #tpu.dot_dimension_numbers<[1], [0], [0], [1], [0, 0, 1, 1], [], []>} : vector<8x32xf32>, vector<32x16xf32>, vector<8x16xf32> -> vector<8x16xf32>
    %c1_148 = arith.constant 1 : index
    %c1_149 = arith.constant 1 : index
    %c0_150 = arith.constant 0 : index
    %c0_151 = arith.constant 0 : index
    %190 = vector.load %arg3[%c1_148, %c1_149, %c0_150, %c0_151] : memref<2x2x1x16xf32, #tpu.memory_space<vmem>>, vector<1x1x1x16xf32>
    %191 = vector.shape_cast %190 : vector<1x1x1x16xf32> to vector<1x16xf32>
    %192 = vector.broadcast %191 : vector<1x16xf32> to vector<8x16xf32>
    %193 = arith.addf %189, %192 : vector<8x16xf32>
    %c1_152 = arith.constant 1 : index
    %c1_153 = arith.constant 1 : index
    %c0_154 = arith.constant 0 : index
    %c0_155 = arith.constant 0 : index
    %194 = vector.load %arg4[%c1_152, %c1_153, %c0_154, %c0_155] : memref<2x2x32x16xf32, #tpu.memory_space<vmem>>, vector<1x1x32x16xf32>
    %195 = vector.shape_cast %194 : vector<1x1x32x16xf32> to vector<32x16xf32>
    %cst_156 = arith.constant dense<0.000000e+00> : vector<8x16xf32>
    %196 = tpu.matmul %150, %195, %cst_156 {dimension_numbers = #tpu.dot_dimension_numbers<[1], [0], [0], [1], [0, 0, 1, 1], [], []>} : vector<8x32xf32>, vector<32x16xf32>, vector<8x16xf32> -> vector<8x16xf32>
    %c1_157 = arith.constant 1 : index
    %c1_158 = arith.constant 1 : index
    %c0_159 = arith.constant 0 : index
    %c0_160 = arith.constant 0 : index
    %197 = vector.load %arg5[%c1_157, %c1_158, %c0_159, %c0_160] : memref<2x2x1x16xf32, #tpu.memory_space<vmem>>, vector<1x1x1x16xf32>
    %198 = vector.shape_cast %197 : vector<1x1x1x16xf32> to vector<1x16xf32>
    %199 = vector.broadcast %198 : vector<1x16xf32> to vector<8x16xf32>
    %200 = arith.addf %196, %199 : vector<8x16xf32>
    %c1_161 = arith.constant 1 : index
    %c1_162 = arith.constant 1 : index
    %c0_163 = arith.constant 0 : index
    %c0_164 = arith.constant 0 : index
    %201 = vector.load %arg6[%c1_161, %c1_162, %c0_163, %c0_164] : memref<2x2x32x16xf32, #tpu.memory_space<vmem>>, vector<1x1x32x16xf32>
    %202 = vector.shape_cast %201 : vector<1x1x32x16xf32> to vector<32x16xf32>
    %cst_165 = arith.constant dense<0.000000e+00> : vector<8x16xf32>
    %203 = tpu.matmul %150, %202, %cst_165 {dimension_numbers = #tpu.dot_dimension_numbers<[1], [0], [0], [1], [0, 0, 1, 1], [], []>} : vector<8x32xf32>, vector<32x16xf32>, vector<8x16xf32> -> vector<8x16xf32>
    %c1_166 = arith.constant 1 : index
    %c1_167 = arith.constant 1 : index
    %c0_168 = arith.constant 0 : index
    %c0_169 = arith.constant 0 : index
    %204 = vector.load %arg7[%c1_166, %c1_167, %c0_168, %c0_169] : memref<2x2x1x16xf32, #tpu.memory_space<vmem>>, vector<1x1x1x16xf32>
    %205 = vector.shape_cast %204 : vector<1x1x1x16xf32> to vector<1x16xf32>
    %206 = vector.broadcast %205 : vector<1x16xf32> to vector<8x16xf32>
    %207 = arith.addf %203, %206 : vector<8x16xf32>
    %cst_170 = arith.constant dense<0.000000e+00> : vector<8x8xf32>
    %208 = tpu.matmul %193, %200, %cst_170 {dimension_numbers = #tpu.dot_dimension_numbers<[1], [1], [0], [0], [0, 0, 1, 0], [], []>} : vector<8x16xf32>, vector<8x16xf32>, vector<8x8xf32> -> vector<8x8xf32>
    %cst_171 = arith.constant dense<0xFF800000> : vector<8xf32>
    %209 = vector.multi_reduction <maximumf>, %208, %cst_171 [1] : vector<8x8xf32> to vector<8xf32>
    %210 = vector.shape_cast %209 : vector<8xf32> to vector<8x1xf32>
    %211 = vector.broadcast %210 : vector<8x1xf32> to vector<8x8xf32>
    %212 = arith.subf %208, %211 : vector<8x8xf32>
    %213 = math.exp %212 : vector<8x8xf32>
    %cst_172 = arith.constant dense<0.000000e+00> : vector<8xf32>
    %214 = vector.multi_reduction <add>, %213, %cst_172 [1] : vector<8x8xf32> to vector<8xf32>
    %215 = vector.shape_cast %214 : vector<8xf32> to vector<8x1xf32>
    %216 = tpu.reciprocal %215 {approx = true} : vector<8x1xf32> -> vector<8x1xf32>
    %217 = vector.broadcast %216 : vector<8x1xf32> to vector<8x8xf32>
    %218 = arith.mulf %213, %217 : vector<8x8xf32>
    %cst_173 = arith.constant dense<0.000000e+00> : vector<8x16xf32>
    %219 = tpu.matmul %218, %207, %cst_173 {dimension_numbers = #tpu.dot_dimension_numbers<[1], [0], [0], [1], [0, 0, 1, 1], [], []>} : vector<8x8xf32>, vector<8x16xf32>, vector<8x16xf32> -> vector<8x16xf32>
    %c1_174 = arith.constant 1 : index
    %c1_175 = arith.constant 1 : index
    %c0_176 = arith.constant 0 : index
    %c0_177 = arith.constant 0 : index
    %220 = vector.load %arg8[%c1_174, %c1_175, %c0_176, %c0_177] : memref<2x2x16x32xf32, #tpu.memory_space<vmem>>, vector<1x1x16x32xf32>
    %221 = vector.shape_cast %220 : vector<1x1x16x32xf32> to vector<16x32xf32>
    %cst_178 = arith.constant dense<0.000000e+00> : vector<8x32xf32>
    %222 = tpu.matmul %219, %221, %cst_178 {dimension_numbers = #tpu.dot_dimension_numbers<[1], [0], [0], [1], [0, 0, 1, 1], [], []>} : vector<8x16xf32>, vector<16x32xf32>, vector<8x32xf32> -> vector<8x32xf32>
    %223 = arith.addf %186, %222 : vector<8x32xf32>
    %224 = arith.addf %134, %223 : vector<8x32xf32>
    %c1_179 = arith.constant 1 : index
    %c0_180 = arith.constant 0 : index
    %c0_181 = arith.constant 0 : index
    %225 = vector.load %arg9[%c1_179, %c0_180, %c0_181] : memref<2x1x32xf32, #tpu.memory_space<vmem>>, vector<1x1x32xf32>
    %226 = vector.shape_cast %225 : vector<1x1x32xf32> to vector<1x32xf32>
    %227 = vector.broadcast %226 : vector<1x32xf32> to vector<8x32xf32>
    %228 = arith.addf %224, %227 : vector<8x32xf32>
    %cst_182 = arith.constant dense<0.000000e+00> : vector<8xf32>
    %229 = vector.multi_reduction <add>, %228, %cst_182 [1] : vector<8x32xf32> to vector<8xf32>
    %230 = vector.shape_cast %229 : vector<8xf32> to vector<8x1xf32>
    %cst_183 = arith.constant 3.200000e+01 : f32
    %231 = vector.broadcast %cst_183 : f32 to vector<8x1xf32>
    %232 = arith.divf %230, %231 : vector<8x1xf32>
    %233 = vector.broadcast %232 : vector<8x1xf32> to vector<8x32xf32>
    %234 = arith.subf %228, %233 : vector<8x32xf32>
    %235 = arith.mulf %234, %234 : vector<8x32xf32>
    %cst_184 = arith.constant dense<0.000000e+00> : vector<8xf32>
    %236 = vector.multi_reduction <add>, %235, %cst_184 [1] : vector<8x32xf32> to vector<8xf32>
    %237 = vector.shape_cast %236 : vector<8xf32> to vector<8x1xf32>
    %cst_185 = arith.constant 3.200000e+01 : f32
    %238 = vector.broadcast %cst_185 : f32 to vector<8x1xf32>
    %239 = arith.divf %237, %238 : vector<8x1xf32>
    %cst_186 = arith.constant 9.99999974E-6 : f32
    %240 = vector.broadcast %cst_186 : f32 to vector<8x1xf32>
    %241 = arith.addf %239, %240 : vector<8x1xf32>
    %242 = math.rsqrt %241 : vector<8x1xf32>
    %243 = vector.broadcast %242 : vector<8x1xf32> to vector<8x32xf32>
    %244 = arith.mulf %234, %243 : vector<8x32xf32>
    %c1_187 = arith.constant 1 : index
    %c0_188 = arith.constant 0 : index
    %c0_189 = arith.constant 0 : index
    %245 = vector.load %arg10[%c1_187, %c0_188, %c0_189] : memref<2x32x64xf32, #tpu.memory_space<vmem>>, vector<1x32x64xf32>
    %246 = vector.shape_cast %245 : vector<1x32x64xf32> to vector<32x64xf32>
    %cst_190 = arith.constant dense<0.000000e+00> : vector<8x64xf32>
    %247 = tpu.matmul %244, %246, %cst_190 {dimension_numbers = #tpu.dot_dimension_numbers<[1], [0], [0], [1], [0, 0, 1, 1], [], []>} : vector<8x32xf32>, vector<32x64xf32>, vector<8x64xf32> -> vector<8x64xf32>
    %c1_191 = arith.constant 1 : index
    %c0_192 = arith.constant 0 : index
    %c0_193 = arith.constant 0 : index
    %248 = vector.load %arg11[%c1_191, %c0_192, %c0_193] : memref<2x1x64xf32, #tpu.memory_space<vmem>>, vector<1x1x64xf32>
    %249 = vector.shape_cast %248 : vector<1x1x64xf32> to vector<1x64xf32>
    %250 = vector.broadcast %249 : vector<1x64xf32> to vector<8x64xf32>
    %251 = arith.addf %247, %250 : vector<8x64xf32>
    %cst_194 = arith.constant 5.000000e-01 : f32
    %252 = vector.broadcast %cst_194 : f32 to vector<8x64xf32>
    %253 = arith.mulf %252, %251 : vector<8x64xf32>
    %cst_195 = arith.constant 0.707106769 : f32
    %254 = vector.broadcast %cst_195 : f32 to vector<8x64xf32>
    %255 = arith.mulf %251, %254 : vector<8x64xf32>
    %256 = math.erf %255 : vector<8x64xf32>
    %cst_196 = arith.constant 1.000000e+00 : f32
    %257 = vector.broadcast %cst_196 : f32 to vector<8x64xf32>
    %258 = arith.addf %257, %256 : vector<8x64xf32>
    %259 = arith.mulf %253, %258 : vector<8x64xf32>
    %c1_197 = arith.constant 1 : index
    %c0_198 = arith.constant 0 : index
    %c0_199 = arith.constant 0 : index
    %260 = vector.load %arg12[%c1_197, %c0_198, %c0_199] : memref<2x64x32xf32, #tpu.memory_space<vmem>>, vector<1x64x32xf32>
    %261 = vector.shape_cast %260 : vector<1x64x32xf32> to vector<64x32xf32>
    %cst_200 = arith.constant dense<0.000000e+00> : vector<8x32xf32>
    %262 = tpu.matmul %259, %261, %cst_200 {dimension_numbers = #tpu.dot_dimension_numbers<[1], [0], [0], [1], [0, 0, 1, 1], [], []>} : vector<8x64xf32>, vector<64x32xf32>, vector<8x32xf32> -> vector<8x32xf32>
    %263 = arith.addf %228, %262 : vector<8x32xf32>
    %c1_201 = arith.constant 1 : index
    %c0_202 = arith.constant 0 : index
    %c0_203 = arith.constant 0 : index
    %264 = vector.load %arg13[%c1_201, %c0_202, %c0_203] : memref<2x1x32xf32, #tpu.memory_space<vmem>>, vector<1x1x32xf32>
    %265 = vector.shape_cast %264 : vector<1x1x32xf32> to vector<1x32xf32>
    %266 = vector.broadcast %265 : vector<1x32xf32> to vector<8x32xf32>
    %267 = arith.addf %263, %266 : vector<8x32xf32>
    %cst_204 = arith.constant dense<0.000000e+00> : vector<8xf32>
    %268 = vector.multi_reduction <add>, %267, %cst_204 [1] : vector<8x32xf32> to vector<8xf32>
    %269 = vector.shape_cast %268 : vector<8xf32> to vector<8x1xf32>
    %cst_205 = arith.constant 3.200000e+01 : f32
    %270 = vector.broadcast %cst_205 : f32 to vector<8x1xf32>
    %271 = arith.divf %269, %270 : vector<8x1xf32>
    %272 = vector.broadcast %271 : vector<8x1xf32> to vector<8x32xf32>
    %273 = arith.subf %267, %272 : vector<8x32xf32>
    %274 = arith.mulf %273, %273 : vector<8x32xf32>
    %cst_206 = arith.constant dense<0.000000e+00> : vector<8xf32>
    %275 = vector.multi_reduction <add>, %274, %cst_206 [1] : vector<8x32xf32> to vector<8xf32>
    %276 = vector.shape_cast %275 : vector<8xf32> to vector<8x1xf32>
    %cst_207 = arith.constant 3.200000e+01 : f32
    %277 = vector.broadcast %cst_207 : f32 to vector<8x1xf32>
    %278 = arith.divf %276, %277 : vector<8x1xf32>
    %cst_208 = arith.constant 9.99999974E-6 : f32
    %279 = vector.broadcast %cst_208 : f32 to vector<8x1xf32>
    %280 = arith.addf %278, %279 : vector<8x1xf32>
    %281 = math.rsqrt %280 : vector<8x1xf32>
    %282 = vector.broadcast %281 : vector<8x1xf32> to vector<8x32xf32>
    %283 = arith.mulf %273, %282 : vector<8x32xf32>
    %c0_209 = arith.constant 0 : index
    %c0_210 = arith.constant 0 : index
    %284 = vector.load %arg14[%c0_209, %c0_210] : memref<1x32xf32, #tpu.memory_space<vmem>>, vector<1x32xf32>
    %285 = vector.broadcast %284 : vector<1x32xf32> to vector<8x32xf32>
    %286 = arith.mulf %283, %285 : vector<8x32xf32>
    %c0_211 = arith.constant 0 : index
    %c0_212 = arith.constant 0 : index
    %287 = vector.load %arg15[%c0_211, %c0_212] : memref<1x32xf32, #tpu.memory_space<vmem>>, vector<1x32xf32>
    %288 = vector.broadcast %287 : vector<1x32xf32> to vector<8x32xf32>
    %289 = arith.addf %286, %288 : vector<8x32xf32>
    %c0_213 = arith.constant 0 : index
    %c0_214 = arith.constant 0 : index
    %c0_215 = arith.constant 0 : index
    %290 = vector.load %arg16[%c0_213, %c0_214, %c0_215] : memref<1x8x32xf32, #tpu.memory_space<vmem>>, vector<1x8x32xf32>
    %291 = vector.shape_cast %290 : vector<1x8x32xf32> to vector<8x32xf32>
    %292 = vector.shape_cast %289 : vector<8x32xf32> to vector<1x8x32xf32>
    tpu.vector_store %arg16[%c0_213, %c0_214, %c0_215], %292 {strides = array<i32>} : memref<1x8x32xf32, #tpu.memory_space<vmem>>, vector<1x8x32xf32>,
    return
  }
  func.func @transform_0(%arg0: i32) -> (i32, i32, i32) {
    %c0_i32 = arith.constant 0 : i32
    %c0_i32_0 = arith.constant 0 : i32
    %c0_i32_1 = arith.constant 0 : i32
    return %arg0, %c0_i32, %c0_i32_0 : i32, i32, i32
  }
  func.func @transform_1(%arg0: i32) -> (i32, i32, i32, i32) {
    %c0_i32 = arith.constant 0 : i32
    %c0_i32_0 = arith.constant 0 : i32
    %c0_i32_1 = arith.constant 0 : i32
    %c0_i32_2 = arith.constant 0 : i32
    %c0_i32_3 = arith.constant 0 : i32
    return %c0_i32, %c0_i32_0, %c0_i32_1, %c0_i32_2 : i32, i32, i32, i32
  }
  func.func @transform_2(%arg0: i32) -> (i32, i32, i32, i32) {
    %c0_i32 = arith.constant 0 : i32
    %c0_i32_0 = arith.constant 0 : i32
    %c0_i32_1 = arith.constant 0 : i32
    %c0_i32_2 = arith.constant 0 : i32
    %c0_i32_3 = arith.constant 0 : i32
    return %c0_i32, %c0_i32_0, %c0_i32_1, %c0_i32_2 : i32, i32, i32, i32
  }
  func.func @transform_3(%arg0: i32) -> (i32, i32, i32, i32) {
    %c0_i32 = arith.constant 0 : i32
    %c0_i32_0 = arith.constant 0 : i32
    %c0_i32_1 = arith.constant 0 : i32
    %c0_i32_2 = arith.constant 0 : i32
    %c0_i32_3 = arith.constant 0 : i32
    return %c0_i32, %c0_i32_0, %c0_i32_1, %c0_i32_2 : i32, i32, i32, i32
  }
  func.func @transform_4(%arg0: i32) -> (i32, i32, i32, i32) {
    %c0_i32 = arith.constant 0 : i32
    %c0_i32_0 = arith.constant 0 : i32
    %c0_i32_1 = arith.constant 0 : i32
    %c0_i32_2 = arith.constant 0 : i32
    %c0_i32_3 = arith.constant 0 : i32
    return %c0_i32, %c0_i32_0, %c0_i32_1, %c0_i32_2 : i32, i32, i32, i32
  }
  func.func @transform_5(%arg0: i32) -> (i32, i32, i32, i32) {
    %c0_i32 = arith.constant 0 : i32
    %c0_i32_0 = arith.constant 0 : i32
    %c0_i32_1 = arith.constant 0 : i32
    %c0_i32_2 = arith.constant 0 : i32
    %c0_i32_3 = arith.constant 0 : i32
    return %c0_i32, %c0_i32_0, %c0_i32_1, %c0_i32_2 : i32, i32, i32, i32
  }
  func.func @transform_6(%arg0: i32) -> (i32, i32, i32, i32) {
    %c0_i32 = arith.constant 0 : i32
    %c0_i32_0 = arith.constant 0 : i32
    %c0_i32_1 = arith.constant 0 : i32
    %c0_i32_2 = arith.constant 0 : i32
    %c0_i32_3 = arith.constant 0 : i32
    return %c0_i32, %c0_i32_0, %c0_i32_1, %c0_i32_2 : i32, i32, i32, i32
  }
  func.func @transform_7(%arg0: i32) -> (i32, i32, i32, i32) {
    %c0_i32 = arith.constant 0 : i32
    %c0_i32_0 = arith.constant 0 : i32
    %c0_i32_1 = arith.constant 0 : i32
    %c0_i32_2 = arith.constant 0 : i32
    %c0_i32_3 = arith.constant 0 : i32
    return %c0_i32, %c0_i32_0, %c0_i32_1, %c0_i32_2 : i32, i32, i32, i32
  }
  func.func @transform_8(%arg0: i32) -> (i32, i32, i32) {
    %c0_i32 = arith.constant 0 : i32
    %c0_i32_0 = arith.constant 0 : i32
    %c0_i32_1 = arith.constant 0 : i32
    %c0_i32_2 = arith.constant 0 : i32
    return %c0_i32, %c0_i32_0, %c0_i32_1 : i32, i32, i32
  }
  func.func @transform_9(%arg0: i32) -> (i32, i32, i32) {
    %c0_i32 = arith.constant 0 : i32
    %c0_i32_0 = arith.constant 0 : i32
    %c0_i32_1 = arith.constant 0 : i32
    %c0_i32_2 = arith.constant 0 : i32
    return %c0_i32, %c0_i32_0, %c0_i32_1 : i32, i32, i32
  }
  func.func @transform_10(%arg0: i32) -> (i32, i32, i32) {
    %c0_i32 = arith.constant 0 : i32
    %c0_i32_0 = arith.constant 0 : i32
    %c0_i32_1 = arith.constant 0 : i32
    %c0_i32_2 = arith.constant 0 : i32
    return %c0_i32, %c0_i32_0, %c0_i32_1 : i32, i32, i32
  }
  func.func @transform_11(%arg0: i32) -> (i32, i32, i32) {
    %c0_i32 = arith.constant 0 : i32
    %c0_i32_0 = arith.constant 0 : i32
    %c0_i32_1 = arith.constant 0 : i32
    %c0_i32_2 = arith.constant 0 : i32
    return %c0_i32, %c0_i32_0, %c0_i32_1 : i32, i32, i32
  }
  func.func @transform_12(%arg0: i32) -> (i32, i32, i32) {
    %c0_i32 = arith.constant 0 : i32
    %c0_i32_0 = arith.constant 0 : i32
    %c0_i32_1 = arith.constant 0 : i32
    %c0_i32_2 = arith.constant 0 : i32
    return %c0_i32, %c0_i32_0, %c0_i32_1 : i32, i32, i32
  }
  func.func @transform_13(%arg0: i32) -> (i32, i32) {
    %c0_i32 = arith.constant 0 : i32
    %c0_i32_0 = arith.constant 0 : i32
    %c0_i32_1 = arith.constant 0 : i32
    return %c0_i32, %c0_i32_0 : i32, i32
  }
  func.func @transform_14(%arg0: i32) -> (i32, i32) {
    %c0_i32 = arith.constant 0 : i32
    %c0_i32_0 = arith.constant 0 : i32
    %c0_i32_1 = arith.constant 0 : i32
    return %c0_i32, %c0_i32_0 : i32, i32
  }
  func.func @transform_15(%arg0: i32) -> (i32, i32, i32) {
    %c0_i32 = arith.constant 0 : i32
    %c0_i32_0 = arith.constant 0 : i32
    %c0_i32_1 = arith.constant 0 : i32
    return %arg0, %c0_i32, %c0_i32_0 : i32, i32, i32
  }
}

</mosaic_0001>

<bundles_post_ra>
// kernel: transformer_encoder.1
= control target key start
LH: loop header
LB: loop body
LE: loop exit
PB: predicated region body
PF: predicated region fallthrough
CT: control target
= control target key end

     0   :  { %s2457_s0 = inlined_call_operand.vmem [shape: f32[2,8,32], index: 0, kind: input, shape index: {}]   ;;  %s2458_s1 = inlined_call_operand.vmem [shape: f32[2,2,32,16], index: 1, kind: input, shape index: {}]   ;;  %s2459_s2 = inlined_call_operand.vmem [shape: f32[2,2,1,16], index: 2, kind: input, shape index: {}]   ;;  %s2460_s3 = inlined_call_operand.vmem [shape: f32[2,2,32,16], index: 3, kind: input, shape index: {}]   ;;  %s2461_s4 = inlined_call_operand.vmem [shape: f32[2,2,1,16], index: 4, kind: input, shape index: {}]   ;;  %s2462_s5 = inlined_call_operand.vmem [shape: f32[2,2,32,16], index: 5, kind: input, shape index: {}]   ;;  %s2463_s6 = inlined_call_operand.vmem [shape: f32[2,2,1,16], index: 6, kind: input, shape index: {}]   ;;  %s2464_s7 = inlined_call_operand.vmem [shape: f32[2,2,16,32], index: 7, kind: input, shape index: {}]   ;;  %s2465_s8 = inlined_call_operand.vmem [shape: f32[2,1,32], index: 8, kind: input, shape index: {}]   ;;  %s2466_s9 = inlined_call_operand.vmem [shape: f32[2,32,64], index: 9, kind: input, shape index: {}]   ;;  %s2467_s10 = inlined_call_operand.vmem [shape: f32[2,1,64], index: 10, kind: input, shape index: {}]   ;;  %s2468_s11 = inlined_call_operand.vmem [shape: f32[2,64,32], index: 11, kind: input, shape index: {}]   ;;  %s2469_s12 = inlined_call_operand.vmem [shape: f32[2,1,32], index: 12, kind: input, shape index: {}]   ;;  %s2470_s13 = inlined_call_operand.vmem [shape: f32[1,32], index: 13, kind: input, shape index: {}]   ;;  %s2471_s14 = inlined_call_operand.vmem [shape: f32[1,32], index: 14, kind: input, shape index: {}]   ;;  %s2472_s15 = inlined_call_operand.hbm [shape: f32[2,8,32], index: 15, kind: output, shape index: {}]  }
   0x1   :  { %2476 = sst [smem:[#allocation8_spill]] %s2457_s0 }
   0x2   :  { %2477 = sst [smem:[#allocation9_spill]] %s2458_s1 }
   0x3   :  { %2478 = sst [smem:[#allocation10_spill]] %s2459_s2 }
   0x4   :  { %20 = vsyncpa [#allocation3], 0 }
   0x5   :  { %22 = vsyncpa [#allocation3 + $0x1], 0  ;;  %s1989_s18 = smov 0   ;;  %s1991_s19 = smov 0  }
   0x6   :  { %s1993_s20 = smov 0   ;;  %s1995_s21 = smov 0  }
   0x7 LB: > { %2479 = sst [smem:[#allocation5_spill]] %s1902_s20  ;;  %s2010_s22 = sadd.s32 4294967295, %s1906_s21   ;;  %s1906_s21 = sphi %s1995_s21, %s2487_s21   ;;  %s1902_s20 = sphi %s1993_s20, %s2489_s20   ;;  %s1898_s19 = sphi %s1991_s19, %s2491_s19   ;;  %s1894_s18 = sphi %s1989_s18, %s2490_s18  }
   0x8   : > { %s1642_s23 = sadd.s32 4294967294, %s1906_s21   ;;  %s2014_s24 = sadd.s32 1, %s1906_s21  }
   0x9   : > { %2480 = sst [smem:[#allocation6_spill]] %s2014_s24  ;;  %s355_s25 = sadd.s32 1, %s1902_s20 }
   0xa   : > { %s352_s26 = ssub.s32 %s1906_s21, %s2014_s24  ;;  %p365_p0 = scmp.ne.s32.totalorder %s1902_s20, %s1898_s19 }
   0xb   : > { %p353_p1 = scmp.eq.s32.totalorder %s352_s26, 0  ;;  %p366_p2 = scmp.eq.s32.totalorder %s2010_s22, 1 }
   0xc   : > { %p371_p3 = scmp.ne.s32.totalorder %s1898_s19, %s1894_s18  ;;  %p372_p4 = scmp.eq.s32.totalorder %s1642_s23, 1 }
   0xd   : > { %s2025_s27 = scalar_select %p353_p1, %s1902_s20, %s355_s25  }
   0xe   : > { %p2027_p5 = por %p366_p2, %p365_p0  ;;  %p2031_p6 = por %p372_p4, %p371_p3 }
   0xf   : > { %2481 = sst [smem:[#allocation7_spill]] %s2025_s27  ;;  %p1645_p7 = scmp.ge.s32.totalorder %s1906_s21, 1 }
  0x10   : > { %p439_p8 = scmp.lt.s32.totalorder %s1906_s21, 3 }
  0x12   : > { %p440_p9 = pnand %p1645_p7, %p439_p8 }
  0x13   : > { %p486_p10 = scmp.lt.s32.totalorder (!%p440_p9), %s2010_s22, 1  ;;  %s2484_s0 = sld [smem:[#allocation8_spill]] (!%p440_p9) }
  0x14   : > { %443 = sbr.rel (%p440_p9) target bundleno = 4331 (0x10eb), region = 80  ;;  %s2485_s1 = sld [smem:[#allocation9_spill]] (!%p440_p9) }
  0x15   : > { %s2486_s2 = sld [smem:[#allocation10_spill]] (!%p440_p9)  ;;  %s1749_s20 = sshll.u32 (!%p440_p9), %s2010_s22, 3 }
  0x16   : > { %s1578_s17 = scalar_lea.hbm (!%p440_p9), %s2472_s15, %s1749_s20 }
  0x19   : > { %s487_s30 = scalar_select %p486_p10, %s2010_s22, 1  ;;  %vm491_vm0 = vcmask 261120   ;;  %v1908_v2 = vmov 32.0   ;;  %v555_v15 = vld [vmem:[%s2460_s3 + $0x18] sm:$0xff]  ;;  %v554_v18 = vld [vmem:[%s2460_s3 + $0x10] sm:$0xff]  ;;  %v553_v21 = vld [vmem:[%s2460_s3 + $0x8] sm:$0xff] }
  0x1a   : > { %1812 = vrcp.f32 %v1908_v2  ;;  %v524_v14 = vld [vmem:[%s2485_s1 + $0x18] sm:$0xff]  ;;  %572 = vmatpush.msra.mxu1 %v555_v15  ;;  %v523_v17 = vld [vmem:[%s2485_s1 + $0x10] sm:$0xff]  ;;  %v522_v20 = vld [vmem:[%s2485_s1 + $0x8] sm:$0xff]  ;;  %vm608_vm5 = vcmask 130048   ;;  %vm635_vm6 = vcmask 64512   ;;  %vm982_vm14 = vcmask 523264  }
  0x1b   : > { %s1647_s16 = sshll.u32 %s487_s30, 3  ;;  %v583_v16 = vld [vmem:[%s2462_s5 + $0x18] sm:$0xff]  ;;  %544 = vmatpush.msra.mxu0 %v524_v14  ;;  %v582_v19 = vld [vmem:[%s2462_s5 + $0x10] sm:$0xff]  ;;  %v581_v22 = vld [vmem:[%s2462_s5 + $0x8] sm:$0xff] }
  0x1c   : > { %s489_s25 = scalar_lea.vmem %s2484_s0, %s1647_s16  ;;  %600 = vmatpush.msra.mxu2 %v583_v16  ;;  %573 = vmatpush.msra.mxu1 %v554_v18  ;;  %v521_v23 = vld [vmem:[%s2485_s1] sm:$0xff]  ;;  %v1663_v26 = vld [vmem:[%s2460_s3 + $0x38] sm:$0xff]  ;;  %v1662_v28 = vld [vmem:[%s2460_s3 + $0x30] sm:$0xff]  ;;  %s483_s0 = sand.u32 1, %s1898_s19  }
  0x1d   : > { %v2042_v0 = vld [vmem:[%s489_s25] sm:$0xff]  ;;  %545 = vmatpush.msra.mxu0 %v523_v17  ;;  %v1669_v27 = vld [vmem:[%s2462_s5 + $0x38] sm:$0xff]  ;;  %v1668_v29 = vld [vmem:[%s2462_s5 + $0x30] sm:$0xff]  ;;  %s1646_s27 = sshll.u32 %s483_s0, 3  ;;  %s1568_s24 = scalar_lea.sflag [#allocation3], %s483_s0 }
  0x1e   : > { %v492_v1 = vsel %vm491_vm0, %v2042_v0, 0.0  ;;  %601 = vmatpush.msra.mxu2 %v582_v19  ;;  %574 = vmatpush.msra.mxu1 %v553_v21  ;;  %v552_v24 = vld [vmem:[%s2460_s3] sm:$0xff]  ;;  %v1661_v30 = vld [vmem:[%s2460_s3 + $0x28] sm:$0xff]  ;;  %v1657_v50 = vld [vmem:[%s2485_s1 + $0x38] sm:$0xff] }
  0x1f   : > { %493 = vadd.xlane.f32.xlu0 %v492_v1  ;;  %546 = vmatpush.msra.mxu0 %v522_v20  ;;  %v580_v25 = vld [vmem:[%s2462_s5] sm:$0xff]  ;;  %v1667_v31 = vld [vmem:[%s2462_s5 + $0x28] sm:$0xff]  ;;  %v1656_v53 = vld [vmem:[%s2485_s1 + $0x30] sm:$0xff] }
  0x20   : > { %v1813_v3 = vpop.eup %1812  ;;  %602 = vmatpush.msra.mxu2 %v581_v22  ;;  %575 = vmatpush.msra.mxu1 %v552_v24  ;;  %v1660_v32 = vld [vmem:[%s2460_s3 + $0x20] sm:$0xff]  ;;  %v1655_v55 = vld [vmem:[%s2485_s1 + $0x28] sm:$0xff] }
  0x21   : > { %v496_v4 = vmul.f32 32.0, %v1813_v3  ;;  %vm500_vm1 = vweird.f32 %v1813_v3  ;;  %547 = vmatpush.msra.mxu0 %v521_v23  ;;  %v1666_v33 = vld [vmem:[%s2462_s5 + $0x20] sm:$0xff] }
  0x22   : > { %603 = vmatpush.msra.mxu2 %v580_v25  ;;  %724 = vmatpush.msrb.mxu1 %v1663_v26  ;;  %v1793_v45 = vld [vmem:[%s2461_s4] ss:$0 sm:$0xff]  ;;  %v1794_v54 = vld [vmem:[%s2461_s4 + $0x1] ss:$0 sm:$0xff]  ;;  %v1676_v25 = vld [vmem:[%s2464_s7 + $0x18] sm:$0xff] }
  0x23   : > { %v497_v5 = vsub.f32 1.0, %v496_v4  ;;  %v1792_v46 = vld [vmem:[%s2486_s2] ss:$0 sm:$0xff]  ;;  %v1796_v61 = vld [vmem:[%s2463_s6 + $0x1] ss:$0 sm:$0xff] }
  0x24   : > { %754 = vmatpush.msrb.mxu2 %v1669_v27  ;;  %725 = vmatpush.msrb.mxu1 %v1662_v28  ;;  %v1795_v52 = vld [vmem:[%s2463_s6] ss:$0 sm:$0xff] }
  0x25   : > { %v498_v6 = vmul.f32 %v1813_v3, %v497_v5  ;;  %v1654_v59 = vld [vmem:[%s2485_s1 + $0x20] sm:$0xff] }
  0x26   : > { %755 = vmatpush.msrb.mxu2 %v1668_v29  ;;  %726 = vmatpush.msrb.mxu1 %v1661_v30  ;;  %v670_v16 = vld [vmem:[%s2464_s7] sm:$0xff]  ;;  %v1675_v29 = vld [vmem:[%s2464_s7 + $0x10] sm:$0xff] }
  0x27   : > { %v499_v7 = vadd.f32 %v1813_v3, %v498_v6 }
  0x28   : > { %756 = vmatpush.msrb.mxu2 %v1667_v31  ;;  %727 = vmatpush.msrb.mxu1 %v1660_v32 }
  0x29   : > { %v2046_v8 = vsel %vm500_vm1, %v1813_v3, %v499_v7 }
  0x2a   : > { %757 = vmatpush.msrb.mxu2 %v1666_v33 }
  0x92   : > { %v494_v9 = vpop.xlane.xlu0 %493 }
  0x93   : > { %v502_v10 = vmul.f32 %v2046_v8, %v494_v9  ;;  %v671_v9 = vld [vmem:[%s2464_s7 + $0x8] sm:$0xff] }
  0x95   : > { %v503_v11 = vsub.f32 %v2042_v0, %v502_v10 }
  0x97   : > { %v504_v12 = vmul.f32 %v503_v11, %v503_v11 }
  0x99   : > { %v505_v13 = vsel %vm491_vm0, %v504_v12, 0.0 }
  0x9a   : > { %506 = vadd.xlane.f32.xlu0 %v505_v13  ;;  %v1797_v13 = vld [vmem:[%s2486_s2 + $0x1] ss:$0 sm:$0xff] }
 0x10d   : > { %v507_v34 = vpop.xlane.xlu0 %506 }
 0x10e   : > { %v508_v35 = vmul.f32 %v507_v34, %v2046_v8  ;;  %v1798_v34 = vld [vmem:[%s2465_s8] ss:$0 sm:$0xff] }
 0x110   : > { %v509_v36 = vadd.f32 1e-05, %v508_v35 }
 0x112   : > { %1814 = vrsqrt.f32 %v509_v36  ;;  %vm516_vm3 = vweird.f32 %v509_v36 }
 0x118   : > { %v1815_v37 = vpop.eup %1814 }
 0x119   : > { %v511_v38 = vmul.f32 %v1815_v37, %v509_v36  ;;  %vm517_vm2 = vweird.f32 %v1815_v37 }
 0x11a   : > { %vm518_vm4 = vmor %vm516_vm3, %vm517_vm2 }
 0x11b   : > { %v512_v39 = vmul.f32 %v1815_v37, %v511_v38 }
 0x11d   : > { %v513_v40 = vmul.f32 0.5, %v512_v39 }
 0x11f   : > { %v514_v41 = vsub.f32 1.5, %v513_v40 }
 0x121   : > { %v515_v42 = vmul.f32 %v1815_v37, %v514_v41 }
 0x123   : > { %v519_v43 = vsel %vm518_vm4, %v1815_v37, %v515_v42 }
 0x124   : > { %v520_v44 = vmul.f32 %v519_v43, %v503_v11  ;;  %v902_v43 = vld [vmem:[%s2466_s9 + $0x18] sm:$0xff] }
 0x126   : > { %1648 = vmatmul.msk.f32.vlgmr.msra.gmra.mxu0 %vm491_vm0, %v520_v44  ;;  %1649 = vmatmul.msk.f32.vlgmr.msra.gmra.mxu1 %vm491_vm0, %v520_v44 }
 0x127   : > { %1650 = vmatmul.msk.f32.vlgmr.msra.gmra.mxu2 %vm491_vm0, %v520_v44  ;;  %842 = vmatpush.msra.mxu1 %v1676_v25 }
 0x128   : > { %865 = vmatpush.msra.mxu2 %v671_v9 }
 0x129   : > { %843 = vmatpush.msra.mxu1 %v1675_v29 }
 0x12a   : > { %866 = vmatpush.msra.mxu2 %v670_v16 }
 0x12e   : > { %1665 = vmatmul.msk.f32.vlgmr.msrb.gmra.mxu1 %vm491_vm0, %v520_v44 }
 0x12f   : > { %1671 = vmatmul.msk.f32.vlgmr.msrb.gmra.mxu2 %vm491_vm0, %v520_v44 }
 0x1a3   : > { %v577_v47 = vpop.f32.mrf.mxu1  ;;  %v549_v48 = vpop.f32.mrf.mxu0 }
 0x1a4   : > { %v578_v49 = vadd.f32 %v1793_v45, %v577_v47  ;;  %v550_v51 = vadd.f32 %v1792_v46, %v549_v48  ;;  %v899_v45 = vld [vmem:[%s2466_s9] sm:$0xff] }
 0x1a6   : > { %1651 = vmatpush.xpose.msk.msrb.mxu0 %vm608_vm5, %v578_v49 }
 0x1a9   : > { %1652 = vmatmul.msk.f32.vlgmr.msrb.gmra.mxu0 %vm608_vm5, %v550_v51 }
 0x1aa   : > { %694 = vmatpush.msra.mxu0 %v1657_v50  ;;  %v605_v56 = vpop.f32.mrf.mxu2 }
 0x1ab   : > { %v729_v57 = vpop.f32.mrf.mxu1  ;;  %v606_v58 = vadd.f32 %v1795_v52, %v605_v56 }
 0x1ac   : > { %695 = vmatpush.msra.mxu0 %v1656_v53  ;;  %v730_v60 = vadd.f32 %v1794_v54, %v729_v57  ;;  %v1799_v57 = vld [vmem:[%s2467_s10] ss:$0 sm:$0xff] }
 0x1ad   : > { %665 = vmatpush.msra.mxu3 %v606_v58 }
 0x1ae   : > { %696 = vmatpush.msra.mxu0 %v1655_v55 }
 0x1af   : > { %1672 = vmatpush.xpose.msk.msrb.mxu3 %vm608_vm5, %v730_v60 }
 0x1b0   : > { %697 = vmatpush.msra.mxu0 %v1654_v59 }
 0x1b1   : > { %1659 = vmatmul.msk.f32.vlgmr.msra.gmra.mxu0 %vm491_vm0, %v520_v44  ;;  %v900_v44 = vld [vmem:[%s2466_s9 + $0x8] sm:$0xff] }
 0x1b2   : > { %v759_v62 = vpop.f32.mrf.mxu2 }
 0x1b3   : > { %v760_v63 = vadd.f32 %v1796_v61, %v759_v62 }
 0x1b5   : > { %817 = vmatpush.msrb.mxu0 %v760_v63  ;;  %v981_v63 = vld [vmem:[%s2468_s11 + $0x38] sm:$0xff] }
 0x1b7   : > { %994 = vmatpush.msra.mxu0 %v981_v63  ;;  %v1689_v63 = vld [vmem:[%s2460_s3 + $0x48] sm:$0xff] }
 0x226   : > { %v632_v1 = vpop.f32.mrf.mxu0 }
 0x227   : > { %v636_v2 = vsel %vm635_vm6, %v632_v1, -inf }
 0x228   : > { %637 = vmax.xlane.f32.xlu1 %v636_v2 }
 0x22e   : > { %v699_v14 = vpop.f32.mrf.mxu0 }
 0x22f   : > { %v700_v15 = vadd.f32 %v1797_v13, %v699_v14 }
 0x29b   : > { %v638_v3 = vpop.xlane.xlu1 %637 }
 0x29c   : > { %v639_v4 = vsub.f32 %v632_v1, %v638_v3  ;;  %v980_v3 = vld [vmem:[%s2468_s11 + $0x30] sm:$0xff] }
 0x29d   : > { %995 = vmatpush.msra.mxu0 %v980_v3  ;;  %v1682_v3 = vld [vmem:[%s2485_s1 + $0x40] sm:$0xff] }
 0x29e   : > { %v640_v5 = vmul.f32 1.442695, %v639_v4 }
 0x2a0   : > { %1816 = vpow2.f32 %v640_v5 }
 0x2a6   : > { %v1817_v6 = vpop.eup %1816 }
 0x2a7   : > { %v642_v7 = vsel %vm635_vm6, %v1817_v6, 0.0 }
 0x2a8   : > { %643 = vadd.xlane.f32.xlu1 %v642_v7 }
 0x31b   : > { %v644_v10 = vpop.xlane.xlu1 %643 }
 0x31c   : > { %1818 = vrcp.f32 %v644_v10  ;;  %v978_v10 = vld [vmem:[%s2468_s11 + $0x20] sm:$0xff] }
 0x322   : > { %v1819_v11 = vpop.eup %1818 }
 0x323   : > { %v646_v12 = vmul.f32 %v1819_v11, %v1817_v6  ;;  %v979_v6 = vld [vmem:[%s2468_s11 + $0x28] sm:$0xff] }
 0x324   : > { %996 = vmatpush.msra.mxu0 %v979_v6  ;;  %v1711_v6 = vld [vmem:[%s2460_s3 + $0x60] sm:$0xff] }
 0x325   : > { %1653 = vmatmul.msk.f32.vlgmr.msra.gmra.mxu3 %vm635_vm6, %v646_v12  ;;  %v977_v12 = vld [vmem:[%s2468_s11 + $0x18] sm:$0xff] }
 0x326   : > { %922 = vmatpush.msra.mxu3 %v902_v43  ;;  %997 = vmatpush.msra.mxu0 %v978_v10  ;;  %v1706_v10 = vld [vmem:[%s2485_s1 + $0x68] sm:$0xff] }
 0x328   : > { %998 = vmatpush.msra.mxu0 %v977_v12 }
 0x32d   : > { %1673 = vmatmul.msk.f32.vlgmr.msrb.gmra.mxu3 %vm608_vm5, %v700_v15  ;;  %v976_v15 = vld [vmem:[%s2468_s11 + $0x10] sm:$0xff] }
 0x32e   : > { %999 = vmatpush.msra.mxu0 %v976_v15 }
 0x3a8   : > { %v667_v17 = vpop.f32.mrf.mxu3 }
 0x3a9   : > { %1678 = vmatmul.msk.f32.vlgmr.msra.gmra.mxu2 %vm608_vm5, %v667_v17  ;;  %v975_v17 = vld [vmem:[%s2468_s11 + $0x8] sm:$0xff] }
 0x3aa   : > { %1000 = vmatpush.msra.mxu0 %v975_v17 }
 0x3b0   : > { %v785_v18 = vpop.f32.mrf.mxu3 }
 0x3b1   : > { %v788_v19 = vsel %vm635_vm6, %v785_v18, -inf }
 0x3b2   : > { %789 = vmax.xlane.f32.xlu2 %v788_v19  ;;  %v974_v19 = vld [vmem:[%s2468_s11] sm:$0xff] }
 0x3b3   : > { %1001 = vmatpush.msra.mxu0 %v974_v19 }
 0x425   : > { %v790_v20 = vpop.xlane.xlu2 %789 }
 0x426   : > { %v791_v21 = vsub.f32 %v785_v18, %v790_v20 }
 0x428   : > { %v792_v22 = vmul.f32 1.442695, %v791_v21 }
 0x42a   : > { %1820 = vpow2.f32 %v792_v22 }
 0x42c   : > { %v868_v31 = vpop.f32.mrf.mxu2 }
 0x430   : > { %v1821_v23 = vpop.eup %1820 }
 0x431   : > { %v794_v24 = vsel %vm635_vm6, %v1821_v23, 0.0 }
 0x432   : > { %795 = vadd.xlane.f32.xlu2 %v794_v24 }
 0x4a5   : > { %v796_v26 = vpop.xlane.xlu2 %795 }
 0x4a6   : > { %1822 = vrcp.f32 %v796_v26 }
 0x4ac   : > { %v1823_v27 = vpop.eup %1822 }
 0x4ad   : > { %v798_v28 = vmul.f32 %v1823_v27, %v1821_v23 }
 0x4af   : > { %1674 = vmatmul.msk.f32.vlgmr.msrb.gmra.mxu0 %vm635_vm6, %v798_v28 }
 0x52c   : > { %v819_v30 = vpop.f32.mrf.mxu0 }
 0x52d   : > { %1677 = vmatmul.msk.f32.vlgmr.msra.gmra.mxu1 %vm608_vm5, %v819_v30 }
 0x5aa   : > { %v845_v32 = vpop.f32.mrf.mxu1 }
 0x5ab   : > { %v869_v33 = vadd.f32 %v868_v31, %v845_v32 }
 0x5ad   : > { %v871_v35 = vadd.f32 %v869_v33, %v2042_v0  ;;  %v901_v0 = vld [vmem:[%s2466_s9 + $0x10] sm:$0xff] }
 0x5ae   : > { %923 = vmatpush.msra.mxu3 %v901_v0 }
 0x5af   : > { %v2176_v36 = vadd.f32 %v1798_v34, %v871_v35 }
 0x5b0   : > { %924 = vmatpush.msra.mxu3 %v900_v44 }
 0x5b1   : > { %v877_v37 = vsel %vm491_vm0, %v2176_v36, 0.0 }
 0x5b2   : > { %878 = vadd.xlane.f32.xlu0 %v877_v37  ;;  %925 = vmatpush.msra.mxu3 %v899_v45  ;;  %v1800_v45 = vld [vmem:[%s2469_s12] ss:$0 sm:$0xff] }
 0x625   : > { %v879_v38 = vpop.xlane.xlu0 %878 }
 0x626   : > { %v880_v39 = vmul.f32 %v879_v38, %v2046_v8 }
 0x628   : > { %v881_v40 = vsub.f32 %v2176_v36, %v880_v39 }
 0x62a   : > { %v882_v41 = vmul.f32 %v881_v40, %v881_v40 }
 0x62c   : > { %v883_v42 = vsel %vm491_vm0, %v882_v41, 0.0 }
 0x62d   : > { %884 = vadd.xlane.f32.xlu1 %v883_v42 }
 0x6a0   : > { %v885_v46 = vpop.xlane.xlu1 %884 }
 0x6a1   : > { %v886_v47 = vmul.f32 %v885_v46, %v2046_v8 }
 0x6a3   : > { %v887_v48 = vadd.f32 1e-05, %v886_v47 }
 0x6a5   : > { %1824 = vrsqrt.f32 %v887_v48  ;;  %vm894_vm8 = vweird.f32 %v887_v48 }
 0x6ab   : > { %v1825_v49 = vpop.eup %1824 }
 0x6ac   : > { %v889_v50 = vmul.f32 %v1825_v49, %v887_v48  ;;  %vm895_vm7 = vweird.f32 %v1825_v49 }
 0x6ad   : > { %vm896_vm9 = vmor %vm894_vm8, %vm895_vm7 }
 0x6ae   : > { %v890_v51 = vmul.f32 %v1825_v49, %v889_v50 }
 0x6b0   : > { %v891_v52 = vmul.f32 0.5, %v890_v51 }
 0x6b2   : > { %v892_v53 = vsub.f32 1.5, %v891_v52 }
 0x6b4   : > { %v893_v54 = vmul.f32 %v1825_v49, %v892_v53 }
 0x6b6   : > { %v897_v55 = vsel %vm896_vm9, %v1825_v49, %v893_v54 }
 0x6b7   : > { %v898_v56 = vmul.f32 %v897_v55, %v881_v40  ;;  %v1685_v55 = vld [vmem:[%s2485_s1 + $0x58] sm:$0xff] }
 0x6b8   : > { %1059 = vmatpush.msrb.mxu1 %v1685_v55 }
 0x6b9   : > { %1679 = vmatmul.msk.f32.vlgmr.msra.gmra.mxu3 %vm491_vm0, %v898_v56  ;;  %v1697_v56 = vld [vmem:[%s2462_s5 + $0x58] sm:$0xff] }
 0x6ba   : > { %1119 = vmatpush.msrb.mxu3 %v1697_v56  ;;  %v1703_v56 = vld [vmem:[%s2464_s7 + $0x20] sm:$0xff] }
 0x73c   : > { %v927_v58 = vpop.f32.mrf.mxu3 }
 0x73d   : > { %v928_v59 = vadd.f32 %v1799_v57, %v927_v58  ;;  %v1714_v57 = vld [vmem:[%s2460_s3 + $0x78] sm:$0xff]  ;;  %v1684_v58 = vld [vmem:[%s2485_s1 + $0x50] sm:$0xff] }
 0x73e   : > { %1242 = vmatpush.msrb.mxu0 %v1714_v57  ;;  %1060 = vmatpush.msrb.mxu1 %v1684_v58 }
 0x73f   : > { %v931_v60 = vmul.f32 0.70710677, %v928_v59  ;;  %v930_v43 = vmul.f32 0.5, %v928_v59  ;;  %v1690_v59 = vld [vmem:[%s2460_s3 + $0x50] sm:$0xff] }
 0x741   : > { %v932_v61 = vmul.f32 %v931_v60, %v931_v60 }
 0x743   : > { %v933_v62 = vmin.f32 %v932_v61, 16.0  ;;  %v1713_v61 = vld [vmem:[%s2460_s3 + $0x70] sm:$0xff] }
 0x744   : > { %1243 = vmatpush.msrb.mxu0 %v1713_v61 }
 0x745   : > { %v934_v1 = vmul.f32 2.1237322e-06, %v933_v62  ;;  %v945_v2 = vmul.f32 3.8918573e-05, %v933_v62 }
 0x747   : > { %v935_v4 = vadd.f32 0.00028619796, %v934_v1  ;;  %v946_v5 = vadd.f32 0.001143296, %v945_v2  ;;  %v1695_v1 = vld [vmem:[%s2462_s5 + $0x48] sm:$0xff] }
 0x748   : > { %v1712_v2 = vld [vmem:[%s2460_s3 + $0x68] sm:$0xff] }
 0x749   : > { %v936_v7 = vmul.f32 %v935_v4, %v933_v62  ;;  %v947_v9 = vmul.f32 %v946_v5, %v933_v62  ;;  %v1688_v4 = vld [vmem:[%s2460_s3 + $0x40] sm:$0xff]  ;;  %1244 = vmatpush.msrb.mxu0 %v1712_v2  ;;  %v1727_v2 = vld [vmem:[%s2464_s7 + $0x38] sm:$0xff] }
 0x74a   : > { %v1694_v5 = vld [vmem:[%s2462_s5 + $0x40] sm:$0xff] }
 0x74b   : > { %v948_v11 = vadd.f32 0.014752088, %v947_v9  ;;  %v937_v13 = vadd.f32 0.0036580483, %v936_v7  ;;  %1245 = vmatpush.msrb.mxu0 %v1711_v6  ;;  %v1708_v7 = vld [vmem:[%s2485_s1 + $0x78] sm:$0xff]  ;;  %v1707_v9 = vld [vmem:[%s2485_s1 + $0x70] sm:$0xff] }
 0x74c   : > { %v1726_v6 = vld [vmem:[%s2464_s7 + $0x30] sm:$0xff] }
 0x74d   : > { %v949_v14 = vmul.f32 %v948_v11, %v933_v62  ;;  %v938_v18 = vmul.f32 %v937_v13, %v933_v62  ;;  %v1705_v11 = vld [vmem:[%s2485_s1 + $0x60] sm:$0xff] }
 0x74f   : > { %v950_v16 = vadd.f32 0.112945676, %v949_v14  ;;  %v939_v22 = vadd.f32 0.05243302, %v938_v18 }
 0x751   : > { %v951_v20 = vmul.f32 %v950_v16, %v933_v62  ;;  %v940_v25 = vmul.f32 %v939_v22, %v933_v62 }
 0x753   : > { %v952_v21 = vadd.f32 0.4994258, %v951_v20  ;;  %v941_v26 = vadd.f32 0.18741608, %v940_v25  ;;  %v1802_v25 = vld [vmem:[%s2461_s4 + $0x3] ss:$0 sm:$0xff] }
 0x755   : > { %v953_v23 = vmul.f32 %v952_v21, %v933_v62  ;;  %v942_v28 = vmul.f32 %v941_v26, %v933_v62  ;;  %v1683_v62 = vld [vmem:[%s2485_s1 + $0x48] sm:$0xff]  ;;  %v1801_v26 = vld [vmem:[%s2486_s2 + $0x2] ss:$0 sm:$0xff]  ;;  %s485_s1 = scalar_lea.vmem [#allocation2], %s1646_s27  ;;  %s1864_s27 = scalar_lea.hbm %s2472_s15, 16 }
 0x756   : > { %1061 = vmatpush.msrb.mxu1 %v1683_v62  ;;  %s1580_s22 = sshll.u32 %s485_s1, 4  ;;  %s1581_s22 = int_to_ptr.vmem [resolvable:$true] %s1580_s22 }
 0x757   : > { %v954_v24 = vadd.f32 1.0, %v953_v23  ;;  %v943_v32 = vadd.f32 1.1283791, %v942_v28  ;;  %v1803_v23 = vld [vmem:[%s2461_s4 + $0x2] ss:$0 sm:$0xff] }
 0x758   : > { %1062 = vmatpush.msrb.mxu1 %v1682_v3 }
 0x759   : > { %1826 = vrcp.f32 %v954_v24  ;;  %v966_v31 = vand.u32 2147483648, %v954_v24  ;;  %v964_v34 = vand.u32 2147483647, %v954_v24  ;;  %vm960_vm11 = vweird.f32 %v954_v24 }
 0x75a   : > { %v944_v38 = vmul.f32 %v943_v32, %v931_v60  ;;  %v1696_v60 = vld [vmem:[%s2462_s5 + $0x50] sm:$0xff]  ;;  %v1720_v32 = vld [vmem:[%s2462_s5 + $0x78] sm:$0xff] }
 0x75b   : > { %v967_v37 = vor.u32 1.1754944e-38, %v966_v31  ;;  %vm965_vm13 = vcmp.eq.f32.partialorder %v964_v34, 8.507059e+37  ;;  %1120 = vmatpush.msrb.mxu3 %v1696_v60 }
 0x75d   : > { %1121 = vmatpush.msrb.mxu3 %v1695_v1 }
 0x75f   : > { %v1827_v27 = vpop.eup %1826  ;;  %1122 = vmatpush.msrb.mxu3 %v1694_v5 }
 0x760   : > { %v956_v29 = vmul.f32 %v1827_v27, %v954_v24  ;;  %vm961_vm10 = vweird.f32 %v1827_v27  ;;  %v1804_v24 = vld [vmem:[%s2463_s6 + $0x2] ss:$0 sm:$0xff] }
 0x761   : > { %vm962_vm12 = vmor %vm960_vm11, %vm961_vm10  ;;  %1212 = vmatpush.msra.mxu3 %v1708_v7 }
 0x762   : > { %v957_v30 = vsub.f32 1.0, %v956_v29 }
 0x763   : > { %1213 = vmatpush.msra.mxu3 %v1707_v9 }
 0x764   : > { %v958_v33 = vmul.f32 %v1827_v27, %v957_v30 }
 0x765   : > { %1214 = vmatpush.msra.mxu3 %v1706_v10 }
 0x766   : > { %v959_v35 = vadd.f32 %v1827_v27, %v958_v33 }
 0x767   : > { %1215 = vmatpush.msra.mxu3 %v1705_v11 }
 0x768   : > { %v963_v39 = vsel %vm962_vm12, %v1827_v27, %v959_v35 }
 0x769   : > { %v968_v40 = vsel %vm965_vm13, %v967_v37, %v963_v39  ;;  %v1719_v37 = vld [vmem:[%s2462_s5 + $0x70] sm:$0xff]  ;;  %v1717_v39 = vld [vmem:[%s2462_s5 + $0x60] sm:$0xff] }
 0x76a   : > { %v969_v41 = vmul.f32 %v968_v40, %v944_v38  ;;  %v1718_v38 = vld [vmem:[%s2462_s5 + $0x68] sm:$0xff] }
 0x76c   : > { %v1680_v42 = vclamps-f32 %v969_v41, 1.0 }
 0x76e   : > { %v972_v0 = vadd.f32 1.0, %v1680_v42  ;;  %v1806_v42 = vld [vmem:[%s2463_s6 + $0x3] ss:$0 sm:$0xff] }
 0x770   : > { %v973_v44 = vmul.f32 %v972_v0, %v930_v43 }
 0x772   : > { %1681 = vmatmul.msk.f32.vlgmr.msra.gmra.mxu0 %vm982_vm14, %v973_v44 }
 0x773   : > { %1360 = vmatpush.msra.mxu0 %v1727_v2 }
 0x775   : > { %1361 = vmatpush.msra.mxu0 %v1726_v6 }
 0x7ef   : > { %v1003_v46 = vpop.f32.mrf.mxu0 }
 0x7f0   : > { %v1006_v47 = vadd.f32 %v1003_v46, %v2176_v36  ;;  %v1691_v36 = vld [vmem:[%s2460_s3 + $0x58] sm:$0xff] }
 0x7f1   : > { %1089 = vmatpush.msrb.mxu2 %v1691_v36 }
 0x7f2   : > { %v2229_v48 = vadd.f32 %v1800_v45, %v1006_v47 }
 0x7f3   : > { %1090 = vmatpush.msrb.mxu2 %v1690_v59 }
 0x7f4   : > { %v1012_v49 = vsel %vm491_vm0, %v2229_v48, 0.0 }
 0x7f5   : > { %1013 = vadd.xlane.f32.xlu2 %v1012_v49  ;;  %1091 = vmatpush.msrb.mxu2 %v1689_v63 }
 0x7f7   : > { %1092 = vmatpush.msrb.mxu2 %v1688_v4 }
 0x868   : > { %v1014_v50 = vpop.xlane.xlu2 %1013 }
 0x869   : > { %v1015_v51 = vmul.f32 %v1014_v50, %v2046_v8  ;;  %v1704_v50 = vld [vmem:[%s2464_s7 + $0x28] sm:$0xff] }
 0x86b   : > { %v1016_v52 = vsub.f32 %v2229_v48, %v1015_v51 }
 0x86d   : > { %v1017_v53 = vmul.f32 %v1016_v52, %v1016_v52 }
 0x86f   : > { %v1018_v54 = vsel %vm491_vm0, %v1017_v53, 0.0 }
 0x870   : > { %1019 = vadd.xlane.f32.xlu0 %v1018_v54  ;;  %v1805_v54 = vld [vmem:[%s2486_s2 + $0x3] ss:$0 sm:$0xff]  ;;  %s1582_s2 = sshll.u32 %s1578_s17, 4  ;;  %s1583_s2 = int_to_ptr.hbm [resolvable:$true] %s1582_s2 }
 0x871   : > { %s1858_s26 = sshra.s32 %s1583_s2, 4  ;;  %s1859_s26 = int_to_ptr.hbm [resolvable:$true] %s1858_s26 }
 0x872   : > { %s1860_s20 = scalar_lea.hbm %s1859_s26, 8  ;;  %p1865_p0 = scmp.lt.s32.totalorder %s1859_s26, %s2472_s15 }
 0x873   : > { %p1861_p11 = scmp.ne.s32.totalorder %s1859_s26, %s1860_s20  ;;  %p1866_p1 = scmp.lt.s32.totalorder %s1864_s27, %s1860_s20 }
 0x875   : > { %p1862_p12 = pnand %p1861_p11, %p2027_p5  ;;  %p1867_p2 = por %p1866_p1, %p1865_p0 }
 0x877   : > { %p1863_p13 = pneg %p1862_p12 }
 0x879   : > { %p1868_p3 = pnand %p1867_p2, %p1863_p13 }
 0x8e3   : > { %v1020_v12 = vpop.xlane.xlu0 %1019 }
 0x8e4   : > { %v1021_v13 = vmul.f32 %v1020_v12, %v2046_v8  ;;  %v1807_v12 = vld [vmem:[%s2465_s8 + $0x1] ss:$0 sm:$0xff] }
 0x8e6   : > { %v1022_v14 = vadd.f32 1e-05, %v1021_v13 }
 0x8e8   : > { %1828 = vrsqrt.f32 %v1022_v14  ;;  %vm1029_vm1 = vweird.f32 %v1022_v14 }
 0x8ee   : > { %v1829_v15 = vpop.eup %1828 }
 0x8ef   : > { %v1024_v16 = vmul.f32 %v1829_v15, %v1022_v14  ;;  %vm1030_vm15 = vweird.f32 %v1829_v15 }
 0x8f0   : > { %vm1031_vm2 = vmor %vm1029_vm1, %vm1030_vm15 }
 0x8f1   : > { %v1025_v17 = vmul.f32 %v1829_v15, %v1024_v16 }
 0x8f3   : > { %v1026_v18 = vmul.f32 0.5, %v1025_v17 }
 0x8f5   : > { %v1027_v19 = vsub.f32 1.5, %v1026_v18 }
 0x8f7   : > { %v1028_v20 = vmul.f32 %v1829_v15, %v1027_v19 }
 0x8f9   : > { %v1032_v21 = vsel %vm1031_vm2, %v1829_v15, %v1028_v20 }
 0x8fa   : > { %v1033_v22 = vmul.f32 %v1032_v21, %v1016_v52  ;;  %v1734_v21 = vld [vmem:[%s2466_s9 + $0x38] sm:$0xff] }
 0x8fc   : > { %1687 = vmatmul.msk.f32.vlgmr.msrb.gmra.mxu1 %vm491_vm0, %v1033_v22  ;;  %1693 = vmatmul.msk.f32.vlgmr.msrb.gmra.mxu2 %vm491_vm0, %v1033_v22 }
 0x8fd   : > { %1699 = vmatmul.msk.f32.vlgmr.msrb.gmra.mxu3 %vm491_vm0, %v1033_v22  ;;  %1716 = vmatmul.msk.f32.vlgmr.msrb.gmra.mxu0 %vm491_vm0, %v1033_v22 }
 0x905   : > { %1710 = vmatmul.msk.f32.vlgmr.msra.gmra.mxu3 %vm491_vm0, %v1033_v22 }
 0x979   : > { %v1064_v29 = vpop.f32.mrf.mxu1 }
 0x97a   : > { %v1247_v27 = vpop.f32.mrf.mxu0  ;;  %v1065_v35 = vadd.f32 %v1801_v26, %v1064_v29 }
 0x97b   : > { %v1248_v34 = vadd.f32 %v1802_v25, %v1247_v27 }
 0x97f   : > { %v1094_v28 = vpop.f32.mrf.mxu2 }
 0x980   : > { %v1095_v30 = vadd.f32 %v1803_v23, %v1094_v28  ;;  %v1124_v31 = vpop.f32.mrf.mxu3  ;;  %v1731_v23 = vld [vmem:[%s2466_s9 + $0x20] sm:$0xff] }
 0x981   : > { %v1125_v33 = vadd.f32 %v1804_v24, %v1124_v31 }
 0x982   : > { %1700 = vmatpush.xpose.msk.msra.mxu1 %vm608_vm5, %v1095_v30 }
 0x983   : > { %1182 = vmatpush.msra.mxu2 %v1125_v33 }
 0x985   : > { %1723 = vmatpush.xpose.msk.msrb.mxu2 %vm608_vm5, %v1248_v34  ;;  %1701 = vmatmul.msk.f32.vlgmr.msra.gmra.mxu1 %vm608_vm5, %v1065_v35  ;;  %v1808_v35 = vld [vmem:[%s2467_s10 + $0x1] ss:$0 sm:$0xff] }
 0x986   : > { %1272 = vmatpush.msrb.mxu1 %v1720_v32 }
 0x988   : > { %1273 = vmatpush.msrb.mxu1 %v1719_v37  ;;  %v1217_v55 = vpop.f32.mrf.mxu3 }
 0x989   : > { %v1218_v36 = vadd.f32 %v1805_v54, %v1217_v55 }
 0x98a   : > { %1274 = vmatpush.msrb.mxu1 %v1718_v38 }
 0x98c   : > { %1275 = vmatpush.msrb.mxu1 %v1717_v39 }
 0x98d   : > { %1722 = vmatmul.msk.f32.vlgmr.msrb.gmra.mxu1 %vm491_vm0, %v1033_v22  ;;  %v1732_v22 = vld [vmem:[%s2466_s9 + $0x28] sm:$0xff] }
 0x98e   : > { %1383 = vmatpush.msra.mxu1 %v1704_v50 }
 0x990   : > { %1384 = vmatpush.msra.mxu1 %v1703_v56 }
 0xa02   : > { %v1150_v40 = vpop.f32.mrf.mxu1 }
 0xa03   : > { %v1153_v41 = vsel %vm635_vm6, %v1150_v40, -inf }
 0xa04   : > { %1154 = vmax.xlane.f32.xlu1 %v1153_v41 }
 0xa0a   : > { %v1277_v43 = vpop.f32.mrf.mxu1 }
 0xa0b   : > { %v1278_v0 = vadd.f32 %v1806_v42, %v1277_v43  ;;  %v1745_v42 = vld [vmem:[%s2468_s11 + $0x78] sm:$0xff] }
 0xa0d   : > { %1335 = vmatpush.msrb.mxu3 %v1278_v0 }
 0xa0f   : > { %1515 = vmatpush.msra.mxu3 %v1745_v42  ;;  %v1810_v42 = vld [vmem:[%s2470_s13] ss:$0 sm:$0xff] }
 0xa77   : > { %v1155_v44 = vpop.xlane.xlu1 %1154 }
 0xa78   : > { %v1156_v45 = vsub.f32 %v1150_v40, %v1155_v44  ;;  %v1744_v44 = vld [vmem:[%s2468_s11 + $0x70] sm:$0xff] }
 0xa79   : > { %1516 = vmatpush.msra.mxu3 %v1744_v44 }
 0xa7a   : > { %v1157_v46 = vmul.f32 1.442695, %v1156_v45 }
 0xa7c   : > { %1830 = vpow2.f32 %v1157_v46 }
 0xa82   : > { %v1831_v47 = vpop.eup %1830 }
 0xa83   : > { %v1159_v49 = vsel %vm635_vm6, %v1831_v47, 0.0 }
 0xa84   : > { %1160 = vadd.xlane.f32.xlu2 %v1159_v49 }
 0xaf7   : > { %v1161_v51 = vpop.xlane.xlu2 %1160 }
 0xaf8   : > { %1832 = vrcp.f32 %v1161_v51  ;;  %v1742_v51 = vld [vmem:[%s2468_s11 + $0x60] sm:$0xff] }
 0xafe   : > { %v1833_v52 = vpop.eup %1832 }
 0xaff   : > { %v1163_v53 = vmul.f32 %v1833_v52, %v1831_v47  ;;  %v1743_v47 = vld [vmem:[%s2468_s11 + $0x68] sm:$0xff] }
 0xb00   : > { %1517 = vmatpush.msra.mxu3 %v1743_v47 }
 0xb01   : > { %1702 = vmatmul.msk.f32.vlgmr.msra.gmra.mxu2 %vm635_vm6, %v1163_v53  ;;  %v1741_v53 = vld [vmem:[%s2468_s11 + $0x58] sm:$0xff] }
 0xb02   : > { %1443 = vmatpush.msra.mxu2 %v1734_v21  ;;  %1518 = vmatpush.msra.mxu3 %v1742_v51 }
 0xb04   : > { %1519 = vmatpush.msra.mxu3 %v1741_v53 }
 0xb09   : > { %1724 = vmatmul.msk.f32.vlgmr.msrb.gmra.mxu2 %vm608_vm5, %v1218_v36  ;;  %v1740_v36 = vld [vmem:[%s2468_s11 + $0x50] sm:$0xff] }
 0xb0a   : > { %1520 = vmatpush.msra.mxu3 %v1740_v36 }
 0xb84   : > { %v1184_v57 = vpop.f32.mrf.mxu2 }
 0xb85   : > { %1729 = vmatmul.msk.f32.vlgmr.msra.gmra.mxu1 %vm608_vm5, %v1184_v57  ;;  %v1739_v57 = vld [vmem:[%s2468_s11 + $0x48] sm:$0xff] }
 0xb86   : > { %1521 = vmatpush.msra.mxu3 %v1739_v57 }
 0xb8c   : > { %v1303_v58 = vpop.f32.mrf.mxu2 }
 0xb8d   : > { %v1306_v59 = vsel %vm635_vm6, %v1303_v58, -inf }
 0xb8e   : > { %1307 = vmax.xlane.f32.xlu0 %v1306_v59  ;;  %v1738_v59 = vld [vmem:[%s2468_s11 + $0x40] sm:$0xff] }
 0xb8f   : > { %1522 = vmatpush.msra.mxu3 %v1738_v59 }
 0xc01   : > { %v1308_v60 = vpop.xlane.xlu0 %1307 }
 0xc02   : > { %v1309_v61 = vsub.f32 %v1303_v58, %v1308_v60  ;;  %v1386_v9 = vpop.f32.mrf.mxu1 }
 0xc04   : > { %v1310_v62 = vmul.f32 1.442695, %v1309_v61 }
 0xc06   : > { %1834 = vpow2.f32 %v1310_v62 }
 0xc0c   : > { %v1835_v63 = vpop.eup %1834 }
 0xc0d   : > { %v1312_v1 = vsel %vm635_vm6, %v1835_v63, 0.0 }
 0xc0e   : > { %1313 = vadd.xlane.f32.xlu1 %v1312_v1 }
 0xc81   : > { %v1314_v3 = vpop.xlane.xlu1 %1313 }
 0xc82   : > { %1836 = vrcp.f32 %v1314_v3 }
 0xc88   : > { %v1837_v4 = vpop.eup %1836 }
 0xc89   : > { %v1316_v5 = vmul.f32 %v1837_v4, %v1835_v63 }
 0xc8b   : > { %1725 = vmatmul.msk.f32.vlgmr.msrb.gmra.mxu3 %vm635_vm6, %v1316_v5 }
 0xd0e   : > { %v1337_v7 = vpop.f32.mrf.mxu3 }
 0xd0f   : > { %1728 = vmatmul.msk.f32.vlgmr.msra.gmra.mxu0 %vm608_vm5, %v1337_v7 }
 0xd8c   : > { %v1363_v10 = vpop.f32.mrf.mxu0 }
 0xd8d   : > { %v1387_v11 = vadd.f32 %v1386_v9, %v1363_v10 }
 0xd8f   : > { %v1389_v13 = vadd.f32 %v1387_v11, %v2229_v48  ;;  %v1733_v48 = vld [vmem:[%s2466_s9 + $0x30] sm:$0xff] }
 0xd90   : > { %1444 = vmatpush.msra.mxu2 %v1733_v48 }
 0xd91   : > { %v2361_v14 = vadd.f32 %v1807_v12, %v1389_v13 }
 0xd92   : > { %1445 = vmatpush.msra.mxu2 %v1732_v22 }
 0xd93   : > { %v1396_v15 = vsel %vm491_vm0, %v2361_v14, 0.0 }
 0xd94   : > { %1397 = vadd.xlane.f32.xlu2 %v1396_v15  ;;  %1446 = vmatpush.msra.mxu2 %v1731_v23  ;;  %v1809_v23 = vld [vmem:[%s2469_s12 + $0x1] ss:$0 sm:$0xff] }
 0xe07   : > { %v1398_v16 = vpop.xlane.xlu2 %1397 }
 0xe08   : > { %v1399_v17 = vmul.f32 %v1398_v16, %v2046_v8 }
 0xe0a   : > { %v1400_v18 = vsub.f32 %v2361_v14, %v1399_v17 }
 0xe0c   : > { %v1401_v19 = vmul.f32 %v1400_v18, %v1400_v18 }
 0xe0e   : > { %v1402_v20 = vsel %vm491_vm0, %v1401_v19, 0.0 }
 0xe0f   : > { %1403 = vadd.xlane.f32.xlu0 %v1402_v20 }
 0xe82   : > { %v1404_v24 = vpop.xlane.xlu0 %1403 }
 0xe83   : > { %v1405_v25 = vmul.f32 %v1404_v24, %v2046_v8 }
 0xe85   : > { %v1406_v26 = vadd.f32 1e-05, %v1405_v25 }
 0xe87   : > { %1838 = vrsqrt.f32 %v1406_v26  ;;  %vm1413_vm4 = vweird.f32 %v1406_v26 }
 0xe8d   : > { %v1839_v27 = vpop.eup %1838 }
 0xe8e   : > { %v1408_v28 = vmul.f32 %v1839_v27, %v1406_v26  ;;  %vm1414_vm3 = vweird.f32 %v1839_v27 }
 0xe8f   : > { %vm1415_vm5 = vmor %vm1413_vm4, %vm1414_vm3 }
 0xe90   : > { %v1409_v29 = vmul.f32 %v1839_v27, %v1408_v28 }
 0xe92   : > { %v1410_v30 = vmul.f32 0.5, %v1409_v29 }
 0xe94   : > { %v1411_v31 = vsub.f32 1.5, %v1410_v30 }
 0xe96   : > { %v1412_v32 = vmul.f32 %v1839_v27, %v1411_v31 }
 0xe98   : > { %v1416_v33 = vsel %vm1415_vm5, %v1839_v27, %v1412_v32 }
 0xe99   : > { %v1417_v34 = vmul.f32 %v1416_v33, %v1400_v18 }
 0xe9b   : > { %1736 = vmatmul.msk.f32.vlgmr.msra.gmra.mxu2 %vm491_vm0, %v1417_v34 }
 0xf1e   : > { %v1448_v37 = vpop.f32.mrf.mxu2 }
 0xf1f   : > { %v1449_v38 = vadd.f32 %v1808_v35, %v1448_v37 }
 0xf21   : > { %v1452_v39 = vmul.f32 0.70710677, %v1449_v38  ;;  %v1451_v21 = vmul.f32 0.5, %v1449_v38 }
 0xf23   : > { %v1453_v40 = vmul.f32 %v1452_v39, %v1452_v39 }
 0xf25   : > { %v1454_v41 = vmin.f32 %v1453_v40, 16.0 }
 0xf27   : > { %v1455_v43 = vmul.f32 2.1237322e-06, %v1454_v41  ;;  %v1466_v0 = vmul.f32 3.8918573e-05, %v1454_v41 }
 0xf29   : > { %v1456_v45 = vadd.f32 0.00028619796, %v1455_v43  ;;  %v1467_v46 = vadd.f32 0.001143296, %v1466_v0  ;;  %v1811_v0 = vld [vmem:[%s2471_s14] ss:$0 sm:$0xff] }
 0xf2b   : > { %v1457_v49 = vmul.f32 %v1456_v45, %v1454_v41  ;;  %v1468_v50 = vmul.f32 %v1467_v46, %v1454_v41 }
 0xf2d   : > { %v1469_v52 = vadd.f32 0.014752088, %v1468_v50  ;;  %v1458_v54 = vadd.f32 0.0036580483, %v1457_v49 }
 0xf2f   : > { %v1470_v55 = vmul.f32 %v1469_v52, %v1454_v41  ;;  %v1459_v58 = vmul.f32 %v1458_v54, %v1454_v41 }
 0xf31   : > { %v1471_v56 = vadd.f32 0.112945676, %v1470_v55  ;;  %v1460_v62 = vadd.f32 0.05243302, %v1459_v58 }
 0xf33   : > { %v1472_v60 = vmul.f32 %v1471_v56, %v1454_v41  ;;  %v1461_v2 = vmul.f32 %v1460_v62, %v1454_v41 }
 0xf35   : > { %v1473_v61 = vadd.f32 0.4994258, %v1472_v60  ;;  %v1462_v3 = vadd.f32 0.18741608, %v1461_v2 }
 0xf37   : > { %v1474_v63 = vmul.f32 %v1473_v61, %v1454_v41  ;;  %v1463_v5 = vmul.f32 %v1462_v3, %v1454_v41 }
 0xf39   : > { %v1475_v1 = vadd.f32 1.0, %v1474_v63  ;;  %v1464_v10 = vadd.f32 1.1283791, %v1463_v5 }
 0xf3b   : > { %1840 = vrcp.f32 %v1475_v1  ;;  %v1487_v9 = vand.u32 2147483648, %v1475_v1  ;;  %v1485_v12 = vand.u32 2147483647, %v1475_v1  ;;  %vm1481_vm7 = vweird.f32 %v1475_v1 }
 0xf3c   : > { %v1465_v16 = vmul.f32 %v1464_v10, %v1452_v39 }
 0xf3d   : > { %v1488_v15 = vor.u32 1.1754944e-38, %v1487_v9  ;;  %vm1486_vm9 = vcmp.eq.f32.partialorder %v1485_v12, 8.507059e+37 }
 0xf41   : > { %v1841_v4 = vpop.eup %1840 }
 0xf42   : > { %v1477_v6 = vmul.f32 %v1841_v4, %v1475_v1  ;;  %vm1482_vm6 = vweird.f32 %v1841_v4 }
 0xf43   : > { %vm1483_vm8 = vmor %vm1481_vm7, %vm1482_vm6 }
 0xf44   : > { %v1478_v7 = vsub.f32 1.0, %v1477_v6 }
 0xf46   : > { %v1479_v11 = vmul.f32 %v1841_v4, %v1478_v7 }
 0xf48   : > { %v1480_v13 = vadd.f32 %v1841_v4, %v1479_v11 }
 0xf4a   : > { %v1484_v17 = vsel %vm1483_vm8, %v1841_v4, %v1480_v13 }
 0xf4b   : > { %v1489_v18 = vsel %vm1486_vm9, %v1488_v15, %v1484_v17 }
 0xf4c   : > { %v1490_v19 = vmul.f32 %v1489_v18, %v1465_v16 }
 0xf4e   : > { %v1737_v20 = vclamps-f32 %v1490_v19, 1.0 }
 0xf50   : > { %v1493_v48 = vadd.f32 1.0, %v1737_v20 }
 0xf52   : > { %v1494_v22 = vmul.f32 %v1493_v48, %v1451_v21 }
 0xf54   : > { %1746 = vmatmul.msk.f32.vlgmr.msra.gmra.mxu3 %vm982_vm14, %v1494_v22 }
 0xfd7   : > { %v1524_v24 = vpop.f32.mrf.mxu3 }
 0xfd8   : > { %v1527_v25 = vadd.f32 %v1524_v24, %v2361_v14 }
 0xfda   : > { %v1533_v26 = vadd.f32 %v1809_v23, %v1527_v25 }
 0xfdc   : > { %v1534_v27 = vsel %vm491_vm0, %v1533_v26, 0.0 }
 0xfdd   : > { %1535 = vadd.xlane.f32.xlu1 %v1534_v27 }
0x1050   : > { %v1536_v28 = vpop.xlane.xlu1 %1535 }
0x1051   : > { %v1537_v29 = vmul.f32 %v1536_v28, %v2046_v8 }
0x1053   : > { %v1538_v30 = vsub.f32 %v1533_v26, %v1537_v29 }
0x1055   : > { %v1539_v31 = vmul.f32 %v1538_v30, %v1538_v30 }
0x1057   : > { %v1540_v32 = vsel %vm491_vm0, %v1539_v31, 0.0 }
0x1058   : > { %1541 = vadd.xlane.f32.xlu2 %v1540_v32 }
0x10cb   : > { %v1542_v33 = vpop.xlane.xlu2 %1541 }
0x10cc   : > { %v1543_v34 = vmul.f32 %v1542_v33, %v2046_v8 }
0x10ce   : > { %v1544_v35 = vadd.f32 1e-05, %v1543_v34 }
0x10d0   : > { %1842 = vrsqrt.f32 %v1544_v35  ;;  %vm1551_vm11 = vweird.f32 %v1544_v35 }
0x10d6   : > { %v1843_v14 = vpop.eup %1842 }
0x10d7   : > { %v1546_v37 = vmul.f32 %v1843_v14, %v1544_v35  ;;  %vm1552_vm10 = vweird.f32 %v1843_v14 }
0x10d8   : > { %vm1553_vm12 = vmor %vm1551_vm11, %vm1552_vm10 }
0x10d9   : > { %v1547_v38 = vmul.f32 %v1843_v14, %v1546_v37 }
0x10db   : > { %v1548_v39 = vmul.f32 0.5, %v1547_v38 }
0x10dd   : > { %v1549_v40 = vsub.f32 1.5, %v1548_v39 }
0x10df   : > { %v1550_v41 = vmul.f32 %v1843_v14, %v1549_v40 }
0x10e1   : > { %v1554_v8 = vsel %vm1553_vm12, %v1843_v14, %v1550_v41 }
0x10e2   : > { %v1555_v43 = vmul.f32 %v1554_v8, %v1538_v30 }
0x10e4   : > { %v1560_v44 = vmul.f32 %v1810_v42, %v1555_v43 }
0x10e6   : > { %v1565_v45 = vadd.f32 %v1811_v0, %v1560_v44 }
0x10e8   : > { %1566 = vst.msk [vmem:[%s485_s1] sm:$0xff] %vm491_vm0, %v1565_v45 }
0x10e9   : > { %1871 = shalt.err (!%p1868_p3)
}
0x10ea   : > { %1752 = dma.vmem_to_hbm [thread:$0]  (%p2027_p5), %s1581_s22, 128, %s1583_s2, %s1568_s24  }
0x10eb PF: > { %p1758_p4 = scmp.ge.s32.totalorder %s1906_s21, 2  ;;  %s1594_s1 = sand.u32 1, %s1894_s18  }
0x10ec   : > { %s1595_s0 = scalar_lea.sflag [#allocation3], %s1594_s1 }
0x10ed   : > { %p1755_p7 = pnand %p1758_p4, %p2031_p6 }
0x10ef   : > { %p1756_p8 = pneg %p1755_p7 }
0x10f1   : > { %1889 = dma.done.wait (%p1756_p8), %s1595_s0, 128  }
0x10f2   : > { %1891 = vsyncadd (%p1756_p8), %s1595_s0, 4294967168  ;;  %s2487_s21 = sld [smem:[#allocation6_spill]]  ;;  %s2490_s18 = smov %s1898_s19 }
0x10f3   : > { %s2488_s25 = sld [smem:[#allocation5_spill]] }
0x10f4   : > { %s2489_s20 = sld [smem:[#allocation7_spill]] }
0x10f8   : > { %p25_p9 = scmp.ge.s32.totalorder %s2487_s21, 4  }
0x10f9   : > { %s2491_s19 = smov %s2488_s25 }
0x10fa   :  { %27 = sbr.rel (!%p25_p9) target bundleno = 7 (0x7), region = 141 }
0x10ff   :  { %1601 = vsyncpa [#allocation3], 1 }
0x1100   :  { %1603 = vsyncpa [#allocation3 + $0x1], 1 }

</bundles_post_ra>
